<compile_context>
chip_gen: v7x
topology: tpu7x:2x2x1
jax: 0.10.0
libtpu: 0.0.40
codegen_flags: <defaults>
</compile_context>

<pallas_src>
import jax
import jax.numpy as jnp
from jax import lax
from jax.experimental import pallas as pl
from jax.experimental.pallas import tpu as pltpu

LEAK = 0.2
EPS = 1e-5
K = 4  # ConvTranspose2d kernel size

# Row-parity taps: output row 2i+r receives (kh, di) with input row ih = i + di,
# derived from oh = 2*ih + kh - 1 (stride=2, padding=1, k=4).
R_TAPS = {
    0: ((1, 0), (3, -1)),   # oh = 2i   : kh=1 -> ih=i   ; kh=3 -> ih=i-1
    1: ((0, 1), (2, 0)),    # oh = 2i+1 : kh=0 -> ih=i+1 ; kh=2 -> ih=i
}


def _upconv_stats_kernel(colcat_ref, rhs_ref, conv_ref, csum_ref, csq_ref):
    """Pass 1: transposed conv for one batch element + per-block channel stats.

    colcat_ref: (H+2, W, 3*Cin) bf16  zero-row-padded, column-im2col'd NHWC input:
                colcat[p, j, dj_idx*Cin + c] = xpad[p, j + dj_idx, c]
    rhs_ref:    (2, 2, 3*Cin, 2*Cout) bf16  per (row parity r, row tap t) weights;
                output columns laid out as q = s*Cout + c (s = column parity)
    conv_ref:   (2, H*W, 2*Cout) bf16  raw conv planes of this batch element:
                conv[r, i*W + j, s*Cout + c] = ConvTranspose output (c, 2i+r, 2j+s)
    csum_ref:   (1, 2*Cout) f32  per-column sum over both parities (this block)
    csq_ref:    (1, 2*Cout) f32  per-column sum of squares (this block)
    """
    Hp, W, K3 = colcat_ref.shape
    H = Hp - 2
    rows = H * W
    C2 = conv_ref.shape[-1]

    # Row-shifted LHS slabs, di in {-1, 0, +1} -> shift a = 1 + di.  Leading-dim
    # slice + (H, W) -> (H*W) collapse is contiguous / tile-aligned when W % 8 == 0.
    lhs = {a: colcat_ref[a:a + H].reshape(rows, K3) for a in (0, 1, 2)}

    csum = jnp.zeros((1, C2), jnp.float32)
    csq = jnp.zeros((1, C2), jnp.float32)

    # 2 row parities x 2 row taps = 4 bf16 MXU matmuls, fp32 accumulation.
    for r in (0, 1):
        (_, di0), (_, di1) = R_TAPS[r]
        acc = jnp.dot(lhs[1 + di0], rhs_ref[r, 0],
                      preferred_element_type=jnp.float32)
        acc = acc + jnp.dot(lhs[1 + di1], rhs_ref[r, 1],
                            preferred_element_type=jnp.float32)
        # BN statistics from the fp32 accumulator, before the bf16 round-off.
        csum = csum + jnp.sum(acc, axis=0, keepdims=True)
        csq = csq + jnp.sum(acc * acc, axis=0, keepdims=True)
        conv_ref[r] = acc.astype(conv_ref.dtype)

    csum_ref[...] = csum
    csq_ref[...] = csq


def _bn_lrelu_kernel(conv_ref, scale_ref, shift_ref, out_ref):
    """Pass 2: LeakyReLU(conv * scale + shift).  fp32 compute, bf16 store."""
    z = conv_ref[...].astype(jnp.float32) * scale_ref[...] + shift_ref[...]
    out_ref[...] = jnp.maximum(z, LEAK * z).astype(out_ref.dtype)


@jax.jit
def dcgan_upconv_forward(x_nchw, w_pt, b, gamma, beta):
    """x_nchw: (N, Cin, H, W); w_pt: (Cin, Cout, 4, 4) PyTorch ConvTranspose2d layout."""
    N, Cin, H, W = x_nchw.shape
    Cout = w_pt.shape[1]
    C2 = 2 * Cout
    HW = H * W
    # ConvTranspose bias is a per-channel constant: train-mode BN's mean subtraction
    # cancels it exactly (and variance is shift-invariant) -> skip the add.
    del b

    # NHWC bf16 + zero halo (padding=1 -> border taps read zeros).
    x = jnp.transpose(x_nchw, (0, 2, 3, 1)).astype(jnp.bfloat16)
    xp = jnp.pad(x, ((0, 0), (1, 1), (1, 1), (0, 0)))
    # Column-im2col: the 3 column shifts dj in {-1, 0, +1} concatenated on channels.
    colcat = jnp.concatenate(
        [xp[:, :, 0:W, :], xp[:, :, 1:W + 1, :], xp[:, :, 2:W + 2, :]],
        axis=-1)                                                  # (N, H+2, W, 3*Cin)

    # Weights: (Cin, Cout, kh, kw) -> per (row parity r, row tap t) matrices of shape
    # (3*Cin, 2*Cout); row blocks indexed by dj_idx, column blocks by column parity s.
    w_k = jnp.transpose(w_pt, (2, 3, 0, 1)).astype(jnp.float32)   # (K, K, Cin, Cout)
    rhs = jnp.zeros((2, 2, 3 * Cin, C2), jnp.float32)
    for r in (0, 1):
        for t, (kh, _) in enumerate(R_TAPS[r]):
            for dj_idx in range(3):                 # dj = dj_idx - 1
                for s in (0, 1):
                    kw = s + 3 - 2 * dj_idx         # from ow = 2*iw + kw - 1, iw = j + dj
                    if 0 <= kw < K:
                        rhs = rhs.at[r, t,
                                     dj_idx * Cin:(dj_idx + 1) * Cin,
                                     s * Cout:(s + 1) * Cout].set(w_k[kh, kw])
    rhs = rhs.astype(jnp.bfloat16)

    # ---- pass 1: gridded conv + per-block stats (batch axis, megacore-parallel) ----
    conv, csum_part, csq_part = pl.pallas_call(
        _upconv_stats_kernel,
        grid=(N,),
        in_specs=[
            pl.BlockSpec((None, H + 2, W, 3 * Cin), lambda n: (n, 0, 0, 0)),
            pl.BlockSpec((2, 2, 3 * Cin, C2), lambda n: (0, 0, 0, 0)),  # resident
        ],
        out_specs=(
            pl.BlockSpec((None, 2, HW, C2), lambda n: (n, 0, 0, 0)),
            pl.BlockSpec((None, 1, C2), lambda n: (n, 0, 0)),
            pl.BlockSpec((None, 1, C2), lambda n: (n, 0, 0)),
        ),
        out_shape=(
            jax.ShapeDtypeStruct((N, 2, HW, C2), jnp.bfloat16),
            jax.ShapeDtypeStruct((N, 1, C2), jnp.float32),
            jax.ShapeDtypeStruct((N, 1, C2), jnp.float32),
        ),
        compiler_params=pltpu.CompilerParams(dimension_semantics=("parallel",)),
    )(colcat, rhs)

    # ---- BN finalize: O(Cout) work between the two pallas_calls ----
    tot_sum = jnp.sum(csum_part[:, 0, :], axis=0)         # (2*Cout,)
    tot_sq = jnp.sum(csq_part[:, 0, :], axis=0)
    ch_sum = tot_sum[:Cout] + tot_sum[Cout:]              # fold the two column parities
    ch_sq = tot_sq[:Cout] + tot_sq[Cout:]
    count = jnp.float32(N * (2 * H) * (2 * W))
    mean = ch_sum / count
    var = ch_sq / count - mean * mean                     # biased, like PyTorch train BN
    scale = gamma.astype(jnp.float32) * lax.rsqrt(var + EPS)
    shift = beta.astype(jnp.float32) - mean * scale
    scale2 = jnp.tile(scale.reshape(1, Cout), (1, 2))     # duplicate over the s halves
    shift2 = jnp.tile(shift.reshape(1, Cout), (1, 2))

    # ---- pass 2: gridded affine + LeakyReLU ----
    out = pl.pallas_call(
        _bn_lrelu_kernel,
        grid=(N, 2),
        in_specs=[
            pl.BlockSpec((None, None, HW, C2), lambda n, r: (n, r, 0, 0)),
            pl.BlockSpec((1, C2), lambda n, r: (0, 0)),
            pl.BlockSpec((1, C2), lambda n, r: (0, 0)),
        ],
        out_specs=pl.BlockSpec((None, None, HW, C2), lambda n, r: (n, r, 0, 0)),
        out_shape=jax.ShapeDtypeStruct((N, 2, HW, C2), jnp.bfloat16),
        compiler_params=pltpu.CompilerParams(
            dimension_semantics=("parallel", "parallel")),
    )(conv, scale2, shift2)

    # (n, r, i, j, s, c) -> NCHW: the parity interleave rides along on the single,
    # unavoidable layout transpose.  Cast back to fp32 to match the module's dtype.
    y = out.reshape(N, 2, H, W, 2, Cout).transpose(0, 5, 2, 1, 3, 4)
    return y.reshape(N, Cout, 2 * H, 2 * W).astype(jnp.float32)


def reference(x, w_pt, b, gamma, beta):
    """Pure-JAX fp32 reference: ConvTranspose2d(4,2,1) + train-mode BatchNorm2d + LeakyReLU."""
    w_conv = jnp.transpose(w_pt, (1, 0, 2, 3))[:, :, ::-1, ::-1]     # (Cout, Cin, 4, 4)
    y = lax.conv_general_dilated(
        x, w_conv, window_strides=(1, 1), padding=((2, 2), (2, 2)),
        lhs_dilation=(2, 2), rhs_dilation=(1, 1),
        dimension_numbers=('NCHW', 'OIHW', 'NCHW'))
    y = y + b[None, :, None, None]
    mean = y.mean(axis=(0, 2, 3), keepdims=True)
    var = y.var(axis=(0, 2, 3), keepdims=True)                       # biased, like PyTorch BN
    z = (y - mean) / jnp.sqrt(var + EPS) * gamma[None, :, None, None] + beta[None, :, None, None]
    return jnp.where(z >= 0, z, LEAK * z)


if __name__ == "__main__":
    key = jax.random.PRNGKey(0)
    k1, k2, k3, k4, k5 = jax.random.split(key, 5)

    N, Cin, Cout, H, W = 2, 4, 8, 16, 16
    x = jax.random.normal(k1, (N, Cin, H, W), jnp.float32)
    w = 0.1 * jax.random.normal(k2, (Cin, Cout, K, K), jnp.float32)   # ConvTranspose2d weight
    b = 0.1 * jax.random.normal(k3, (Cout,), jnp.float32)             # ConvTranspose2d bias
    gamma = 1.0 + 0.1 * jax.random.normal(k4, (Cout,), jnp.float32)   # BN weight
    beta = 0.1 * jax.random.normal(k5, (Cout,), jnp.float32)          # BN bias

    y = jax.block_until_ready(dcgan_upconv_forward(x, w, b, gamma, beta))
    assert y.shape == (N, Cout, 2 * H, 2 * W), y.shape

    y_ref = reference(x, w, b, gamma, beta)
    # Kernel uses bf16 MXU operands + a bf16 intermediate (fp32 accumulation & stats);
    # compare against the fp32 reference with a bf16-appropriate tolerance.
    err = float(jnp.max(jnp.abs(y - y_ref)))
    assert jnp.allclose(y, y_ref, rtol=5e-2, atol=5e-2), err

    print("KERNEL_OK")
</pallas_src>

<mosaic_0001>
module attributes {stable_mosaic.version = 11 : i64} {
  func.func @_upconv_stats_kernel(%arg0: i32, %arg1: memref<1x18x16x12xbf16, #tpu.memory_space<vmem>>, %arg2: memref<2x2x12x16xbf16, #tpu.memory_space<vmem>>, %arg3: memref<1x2x256x16xbf16, #tpu.memory_space<vmem>>, %arg4: memref<1x1x16xf32, #tpu.memory_space<vmem>>, %arg5: memref<1x1x16xf32, #tpu.memory_space<vmem>>) attributes {dimension_semantics = [#tpu.dimension_semantics<parallel>], iteration_bounds = array<i64: 2>, scalar_prefetch = 0 : i64, scratch_operands = 0 : i64, tpu.core_type = #tpu.core_type<tc>, window_params = [{transform_indices = @transform_0, window_bounds = array<i64: 1, 18, 16, 12>}, {pipeline_mode = #tpu.pipeline_mode<synchronous>, transform_indices = @transform_1, window_bounds = array<i64: 2, 2, 12, 16>}, {transform_indices = @transform_2, window_bounds = array<i64: 1, 2, 256, 16>}, {transform_indices = @transform_3, window_bounds = array<i64: 1, 1, 16>}, {transform_indices = @transform_4, window_bounds = array<i64: 1, 1, 16>}]} {
    %c0 = arith.constant 0 : index
    %c0_0 = arith.constant 0 : index
    %c0_1 = arith.constant 0 : index
    %c0_2 = arith.constant 0 : index
    %0 = vector.load %arg1[%c0, %c0_0, %c0_1, %c0_2] : memref<1x18x16x12xbf16, #tpu.memory_space<vmem>>, vector<1x16x16x12xbf16>
    %1 = vector.shape_cast %0 : vector<1x16x16x12xbf16> to vector<16x16x12xbf16>
    %2 = vector.shape_cast %1 : vector<16x16x12xbf16> to vector<256x12xbf16>
    %c0_3 = arith.constant 0 : index
    %c1 = arith.constant 1 : index
    %c0_4 = arith.constant 0 : index
    %c0_5 = arith.constant 0 : index
    %3 = vector.load %arg1[%c0_3, %c1, %c0_4, %c0_5] : memref<1x18x16x12xbf16, #tpu.memory_space<vmem>>, vector<1x16x16x12xbf16>
    %4 = vector.shape_cast %3 : vector<1x16x16x12xbf16> to vector<16x16x12xbf16>
    %5 = vector.shape_cast %4 : vector<16x16x12xbf16> to vector<256x12xbf16>
    %c0_6 = arith.constant 0 : index
    %c2 = arith.constant 2 : index
    %c0_7 = arith.constant 0 : index
    %c0_8 = arith.constant 0 : index
    %6 = vector.load %arg1[%c0_6, %c2, %c0_7, %c0_8] : memref<1x18x16x12xbf16, #tpu.memory_space<vmem>>, vector<1x16x16x12xbf16>
    %7 = vector.shape_cast %6 : vector<1x16x16x12xbf16> to vector<16x16x12xbf16>
    %8 = vector.shape_cast %7 : vector<16x16x12xbf16> to vector<256x12xbf16>
    %cst = arith.constant 0.000000e+00 : f32
    %9 = vector.broadcast %cst : f32 to vector<1x16xf32>
    %cst_9 = arith.constant 0.000000e+00 : f32
    %10 = vector.broadcast %cst_9 : f32 to vector<1x16xf32>
    %c0_10 = arith.constant 0 : index
    %c0_11 = arith.constant 0 : index
    %c0_12 = arith.constant 0 : index
    %c0_13 = arith.constant 0 : index
    %11 = vector.load %arg2[%c0_10, %c0_11, %c0_12, %c0_13] : memref<2x2x12x16xbf16, #tpu.memory_space<vmem>>, vector<1x1x12x16xbf16>
    %12 = vector.shape_cast %11 : vector<1x1x12x16xbf16> to vector<12x16xbf16>
    %cst_14 = arith.constant dense<0.000000e+00> : vector<256x16xf32>
    %13 = tpu.matmul %5, %12, %cst_14 {dimension_numbers = #tpu.dot_dimension_numbers<[1], [0], [0], [1], [0, 0, 1, 1], [], []>} : vector<256x12xbf16>, vector<12x16xbf16>, vector<256x16xf32> -> vector<256x16xf32>
    %c0_15 = arith.constant 0 : index
    %c1_16 = arith.constant 1 : index
    %c0_17 = arith.constant 0 : index
    %c0_18 = arith.constant 0 : index
    %14 = vector.load %arg2[%c0_15, %c1_16, %c0_17, %c0_18] : memref<2x2x12x16xbf16, #tpu.memory_space<vmem>>, vector<1x1x12x16xbf16>
    %15 = vector.shape_cast %14 : vector<1x1x12x16xbf16> to vector<12x16xbf16>
    %cst_19 = arith.constant dense<0.000000e+00> : vector<256x16xf32>
    %16 = tpu.matmul %2, %15, %cst_19 {dimension_numbers = #tpu.dot_dimension_numbers<[1], [0], [0], [1], [0, 0, 1, 1], [], []>} : vector<256x12xbf16>, vector<12x16xbf16>, vector<256x16xf32> -> vector<256x16xf32>
    %17 = arith.addf %13, %16 : vector<256x16xf32>
    %cst_20 = arith.constant dense<0.000000e+00> : vector<16xf32>
    %18 = vector.multi_reduction <add>, %17, %cst_20 [0] : vector<256x16xf32> to vector<16xf32>
    %19 = vector.shape_cast %18 : vector<16xf32> to vector<1x16xf32>
    %20 = arith.addf %9, %19 : vector<1x16xf32>
    %21 = arith.mulf %17, %17 : vector<256x16xf32>
    %cst_21 = arith.constant dense<0.000000e+00> : vector<16xf32>
    %22 = vector.multi_reduction <add>, %21, %cst_21 [0] : vector<256x16xf32> to vector<16xf32>
    %23 = vector.shape_cast %22 : vector<16xf32> to vector<1x16xf32>
    %24 = arith.addf %10, %23 : vector<1x16xf32>
    %25 = arith.truncf %17 : vector<256x16xf32> to vector<256x16xbf16>
    %c0_22 = arith.constant 0 : index
    %c0_23 = arith.constant 0 : index
    %c0_24 = arith.constant 0 : index
    %c0_25 = arith.constant 0 : index
    %26 = vector.load %arg3[%c0_22, %c0_23, %c0_24, %c0_25] : memref<1x2x256x16xbf16, #tpu.memory_space<vmem>>, vector<1x1x256x16xbf16>
    %27 = vector.shape_cast %26 : vector<1x1x256x16xbf16> to vector<256x16xbf16>
    %28 = vector.shape_cast %25 : vector<256x16xbf16> to vector<1x1x256x16xbf16>
    tpu.vector_store %arg3[%c0_22, %c0_23, %c0_24, %c0_25], %28 {strides = array<i32>} : memref<1x2x256x16xbf16, #tpu.memory_space<vmem>>, vector<1x1x256x16xbf16>,
    %c1_26 = arith.constant 1 : index
    %c0_27 = arith.constant 0 : index
    %c0_28 = arith.constant 0 : index
    %c0_29 = arith.constant 0 : index
    %29 = vector.load %arg2[%c1_26, %c0_27, %c0_28, %c0_29] : memref<2x2x12x16xbf16, #tpu.memory_space<vmem>>, vector<1x1x12x16xbf16>
    %30 = vector.shape_cast %29 : vector<1x1x12x16xbf16> to vector<12x16xbf16>
    %cst_30 = arith.constant dense<0.000000e+00> : vector<256x16xf32>
    %31 = tpu.matmul %8, %30, %cst_30 {dimension_numbers = #tpu.dot_dimension_numbers<[1], [0], [0], [1], [0, 0, 1, 1], [], []>} : vector<256x12xbf16>, vector<12x16xbf16>, vector<256x16xf32> -> vector<256x16xf32>
    %c1_31 = arith.constant 1 : index
    %c1_32 = arith.constant 1 : index
    %c0_33 = arith.constant 0 : index
    %c0_34 = arith.constant 0 : index
    %32 = vector.load %arg2[%c1_31, %c1_32, %c0_33, %c0_34] : memref<2x2x12x16xbf16, #tpu.memory_space<vmem>>, vector<1x1x12x16xbf16>
    %33 = vector.shape_cast %32 : vector<1x1x12x16xbf16> to vector<12x16xbf16>
    %cst_35 = arith.constant dense<0.000000e+00> : vector<256x16xf32>
    %34 = tpu.matmul %5, %33, %cst_35 {dimension_numbers = #tpu.dot_dimension_numbers<[1], [0], [0], [1], [0, 0, 1, 1], [], []>} : vector<256x12xbf16>, vector<12x16xbf16>, vector<256x16xf32> -> vector<256x16xf32>
    %35 = arith.addf %31, %34 : vector<256x16xf32>
    %cst_36 = arith.constant dense<0.000000e+00> : vector<16xf32>
    %36 = vector.multi_reduction <add>, %35, %cst_36 [0] : vector<256x16xf32> to vector<16xf32>
    %37 = vector.shape_cast %36 : vector<16xf32> to vector<1x16xf32>
    %38 = arith.addf %20, %37 : vector<1x16xf32>
    %39 = arith.mulf %35, %35 : vector<256x16xf32>
    %cst_37 = arith.constant dense<0.000000e+00> : vector<16xf32>
    %40 = vector.multi_reduction <add>, %39, %cst_37 [0] : vector<256x16xf32> to vector<16xf32>
    %41 = vector.shape_cast %40 : vector<16xf32> to vector<1x16xf32>
    %42 = arith.addf %24, %41 : vector<1x16xf32>
    %43 = arith.truncf %35 : vector<256x16xf32> to vector<256x16xbf16>
    %c0_38 = arith.constant 0 : index
    %c1_39 = arith.constant 1 : index
    %c0_40 = arith.constant 0 : index
    %c0_41 = arith.constant 0 : index
    %44 = vector.load %arg3[%c0_38, %c1_39, %c0_40, %c0_41] : memref<1x2x256x16xbf16, #tpu.memory_space<vmem>>, vector<1x1x256x16xbf16>
    %45 = vector.shape_cast %44 : vector<1x1x256x16xbf16> to vector<256x16xbf16>
    %46 = vector.shape_cast %43 : vector<256x16xbf16> to vector<1x1x256x16xbf16>
    tpu.vector_store %arg3[%c0_38, %c1_39, %c0_40, %c0_41], %46 {strides = array<i32>} : memref<1x2x256x16xbf16, #tpu.memory_space<vmem>>, vector<1x1x256x16xbf16>,
    %c0_42 = arith.constant 0 : index
    %c0_43 = arith.constant 0 : index
    %c0_44 = arith.constant 0 : index
    %47 = vector.load %arg4[%c0_42, %c0_43, %c0_44] : memref<1x1x16xf32, #tpu.memory_space<vmem>>, vector<1x1x16xf32>
    %48 = vector.shape_cast %47 : vector<1x1x16xf32> to vector<1x16xf32>
    %49 = vector.shape_cast %38 : vector<1x16xf32> to vector<1x1x16xf32>
    tpu.vector_store %arg4[%c0_42, %c0_43, %c0_44], %49 {strides = array<i32>} : memref<1x1x16xf32, #tpu.memory_space<vmem>>, vector<1x1x16xf32>,
    %c0_45 = arith.constant 0 : index
    %c0_46 = arith.constant 0 : index
    %c0_47 = arith.constant 0 : index
    %50 = vector.load %arg5[%c0_45, %c0_46, %c0_47] : memref<1x1x16xf32, #tpu.memory_space<vmem>>, vector<1x1x16xf32>
    %51 = vector.shape_cast %50 : vector<1x1x16xf32> to vector<1x16xf32>
    %52 = vector.shape_cast %42 : vector<1x16xf32> to vector<1x1x16xf32>
    tpu.vector_store %arg5[%c0_45, %c0_46, %c0_47], %52 {strides = array<i32>} : memref<1x1x16xf32, #tpu.memory_space<vmem>>, vector<1x1x16xf32>,
    return
  }
  func.func @transform_0(%arg0: i32) -> (i32, i32, i32, i32) {
    %c0_i32 = arith.constant 0 : i32
    %c0_i32_0 = arith.constant 0 : i32
    %c0_i32_1 = arith.constant 0 : i32
    %c0_i32_2 = arith.constant 0 : i32
    return %arg0, %c0_i32, %c0_i32_0, %c0_i32_1 : i32, i32, i32, i32
  }
  func.func @transform_1(%arg0: i32) -> (i32, i32, i32, i32) {
    %c0_i32 = arith.constant 0 : i32
    %c0_i32_0 = arith.constant 0 : i32
    %c0_i32_1 = arith.constant 0 : i32
    %c0_i32_2 = arith.constant 0 : i32
    %c0_i32_3 = arith.constant 0 : i32
    return %c0_i32, %c0_i32_0, %c0_i32_1, %c0_i32_2 : i32, i32, i32, i32
  }
  func.func @transform_2(%arg0: i32) -> (i32, i32, i32, i32) {
    %c0_i32 = arith.constant 0 : i32
    %c0_i32_0 = arith.constant 0 : i32
    %c0_i32_1 = arith.constant 0 : i32
    %c0_i32_2 = arith.constant 0 : i32
    return %arg0, %c0_i32, %c0_i32_0, %c0_i32_1 : i32, i32, i32, i32
  }
  func.func @transform_3(%arg0: i32) -> (i32, i32, i32) {
    %c0_i32 = arith.constant 0 : i32
    %c0_i32_0 = arith.constant 0 : i32
    %c0_i32_1 = arith.constant 0 : i32
    return %arg0, %c0_i32, %c0_i32_0 : i32, i32, i32
  }
  func.func @transform_4(%arg0: i32) -> (i32, i32, i32) {
    %c0_i32 = arith.constant 0 : i32
    %c0_i32_0 = arith.constant 0 : i32
    %c0_i32_1 = arith.constant 0 : i32
    return %arg0, %c0_i32, %c0_i32_0 : i32, i32, i32
  }
}

module attributes {stable_mosaic.version = 11 : i64} {
  func.func @_bn_lrelu_kernel(%arg0: i32, %arg1: i32, %arg2: memref<1x1x256x16xbf16, #tpu.memory_space<vmem>>, %arg3: memref<1x16xf32, #tpu.memory_space<vmem>>, %arg4: memref<1x16xf32, #tpu.memory_space<vmem>>, %arg5: memref<1x1x256x16xbf16, #tpu.memory_space<vmem>>) attributes {dimension_semantics = [#tpu.dimension_semantics<parallel>, #tpu.dimension_semantics<parallel>], iteration_bounds = array<i64: 2, 2>, scalar_prefetch = 0 : i64, scratch_operands = 0 : i64, tpu.core_type = #tpu.core_type<tc>, window_params = [{transform_indices = @transform_0, window_bounds = array<i64: 1, 1, 256, 16>}, {pipeline_mode = #tpu.pipeline_mode<synchronous>, transform_indices = @transform_1, window_bounds = array<i64: 1, 16>}, {pipeline_mode = #tpu.pipeline_mode<synchronous>, transform_indices = @transform_2, window_bounds = array<i64: 1, 16>}, {transform_indices = @transform_3, window_bounds = array<i64: 1, 1, 256, 16>}]} {
    %c0 = arith.constant 0 : index
    %c0_0 = arith.constant 0 : index
    %c0_1 = arith.constant 0 : index
    %c0_2 = arith.constant 0 : index
    %0 = vector.load %arg2[%c0, %c0_0, %c0_1, %c0_2] : memref<1x1x256x16xbf16, #tpu.memory_space<vmem>>, vector<1x1x256x16xbf16>
    %1 = vector.shape_cast %0 : vector<1x1x256x16xbf16> to vector<256x16xbf16>
    %2 = arith.extf %1 : vector<256x16xbf16> to vector<256x16xf32>
    %c0_3 = arith.constant 0 : index
    %c0_4 = arith.constant 0 : index
    %3 = vector.load %arg3[%c0_3, %c0_4] : memref<1x16xf32, #tpu.memory_space<vmem>>, vector<1x16xf32>
    %4 = vector.broadcast %3 : vector<1x16xf32> to vector<256x16xf32>
    %5 = arith.mulf %2, %4 : vector<256x16xf32>
    %c0_5 = arith.constant 0 : index
    %c0_6 = arith.constant 0 : index
    %6 = vector.load %arg4[%c0_5, %c0_6] : memref<1x16xf32, #tpu.memory_space<vmem>>, vector<1x16xf32>
    %7 = vector.broadcast %6 : vector<1x16xf32> to vector<256x16xf32>
    %8 = arith.addf %5, %7 : vector<256x16xf32>
    %cst = arith.constant 2.000000e-01 : f32
    %9 = vector.broadcast %cst : f32 to vector<256x16xf32>
    %10 = arith.mulf %9, %8 : vector<256x16xf32>
    %11 = arith.maximumf %8, %10 : vector<256x16xf32>
    %12 = arith.truncf %11 : vector<256x16xf32> to vector<256x16xbf16>
    %c0_7 = arith.constant 0 : index
    %c0_8 = arith.constant 0 : index
    %c0_9 = arith.constant 0 : index
    %c0_10 = arith.constant 0 : index
    %13 = vector.load %arg5[%c0_7, %c0_8, %c0_9, %c0_10] : memref<1x1x256x16xbf16, #tpu.memory_space<vmem>>, vector<1x1x256x16xbf16>
    %14 = vector.shape_cast %13 : vector<1x1x256x16xbf16> to vector<256x16xbf16>
    %15 = vector.shape_cast %12 : vector<256x16xbf16> to vector<1x1x256x16xbf16>
    tpu.vector_store %arg5[%c0_7, %c0_8, %c0_9, %c0_10], %15 {strides = array<i32>} : memref<1x1x256x16xbf16, #tpu.memory_space<vmem>>, vector<1x1x256x16xbf16>,
    return
  }
  func.func @transform_0(%arg0: i32, %arg1: i32) -> (i32, i32, i32, i32) {
    %c0_i32 = arith.constant 0 : i32
    %c0_i32_0 = arith.constant 0 : i32
    %c0_i32_1 = arith.constant 0 : i32
    return %arg0, %arg1, %c0_i32, %c0_i32_0 : i32, i32, i32, i32
  }
  func.func @transform_1(%arg0: i32, %arg1: i32) -> (i32, i32) {
    %c0_i32 = arith.constant 0 : i32
    %c0_i32_0 = arith.constant 0 : i32
    %c0_i32_1 = arith.constant 0 : i32
    return %c0_i32, %c0_i32_0 : i32, i32
  }
  func.func @transform_2(%arg0: i32, %arg1: i32) -> (i32, i32) {
    %c0_i32 = arith.constant 0 : i32
    %c0_i32_0 = arith.constant 0 : i32
    %c0_i32_1 = arith.constant 0 : i32
    return %c0_i32, %c0_i32_0 : i32, i32
  }
  func.func @transform_3(%arg0: i32, %arg1: i32) -> (i32, i32, i32, i32) {
    %c0_i32 = arith.constant 0 : i32
    %c0_i32_0 = arith.constant 0 : i32
    %c0_i32_1 = arith.constant 0 : i32
    return %arg0, %arg1, %c0_i32, %c0_i32_0 : i32, i32, i32, i32
  }
}

</mosaic_0001>

<bundles_post_ra>
// kernel: dcgan_upconv_forward.3
= control target key start
LH: loop header
LB: loop body
LE: loop exit
PB: predicated region body
PF: predicated region fallthrough
CT: control target
= control target key end

     0   :  { %s927_s12 = smov 0   ;;  %s929_s13 = smov 0   ;;  %s1143_s0 = inlined_call_operand.vmem [shape: bf16[2,2,256,16], index: 0, kind: input, shape index: {}]   ;;  %s1144_s1 = inlined_call_operand.vmem [shape: f32[1,16], index: 1, kind: input, shape index: {}]   ;;  %s1145_s2 = inlined_call_operand.vmem [shape: f32[1,16], index: 2, kind: input, shape index: {}]   ;;  %s1146_s3 = inlined_call_operand.vmem [shape: bf16[2,2,256,16], index: 3, kind: output, shape index: {}]  }
   0x1   :  { %s931_s14 = smov 0   ;;  %s933_s15 = smov 0  }
   0x2   :  { %s935_s16 = smov 0  }
   0x3 LB: > { %s22_s17 = sadd.s32 1, %s897_s14  ;;  %s25_s18 = sadd.s32 1, %s901_s15  ;;  %s905_s16 = sphi %s935_s16, %s13_s16   ;;  %s901_s15 = sphi %s933_s15, %s1150_s15   ;;  %s897_s14 = sphi %s931_s14, %s1149_s14   ;;  %s893_s13 = sphi %s929_s13, %s1148_s13   ;;  %s889_s12 = sphi %s927_s12, %s1147_s12  }
   0x4   : > { %p23_p0 = scmp.ge.s32.totalorder %s22_s17, 2  ;;  %p673_p1 = scmp.ge.s32.totalorder %s905_s16, 1 }
   0x5   : > { %p157_p2 = scmp.lt.s32.totalorder %s905_s16, 5 }
   0x6   : > { %s1152_s17 = smov (%p23_p0, %s22_s17), 0  ;;  %s1154_s18 = smov (!%p23_p0, %s25_s18), %s901_s15 }
   0x7   : > { %p158_p3 = pnand %p673_p1, %p157_p2  ;;  %p27_p4 = scmp.ge.s32.totalorder %s1154_s18, 2 }
   0x8   : > { %p189_p5 = scmp.lt.s32.totalorder (!%p158_p3), %s893_s13, 1  ;;  %p191_p6 = scmp.lt.s32.totalorder (!%p158_p3), %s889_s12, 1  ;;  %v970_v0 = vld [vmem:[%s1144_s1] ss:$0 sm:$0xff] (!%p158_p3)  ;;  %vm541_vm0 = vcmask (!%p158_p3), 125952  }
   0x9   : > { %s1156_s18 = smov (%p27_p4, %s1154_s18), 0  ;;  %161 = sbr.rel (%p158_p3) target bundleno = 74 (0x4a), region = 32 }
   0xa   : > { %v979_v9 = vld [vmem:[%s1145_s2] ss:$0 sm:$0xff] (!%p158_p3) }
  0x10   : > { %s1158_s13 = smov (!%p189_p5, %s893_s13), 1  ;;  %s1160_s12 = smov (!%p191_p6, %s889_s12), 1 }
  0x11   : > { %s675_s19 = sshll.u32 %s1158_s13, 6  ;;  %s674_s20 = sshll.u32 %s1160_s12, 5 }
  0x12   : > { %s957_s21 = sadd.s32 %s675_s19, %s674_s20 }
  0x13   : > { %s676_s22 = sshll.u32 %s957_s21, 2 }
  0x14   : > { %s965_s25 = scalar_lea.vmem %s1143_s0, %s676_s22  ;;  %s1003_s5 = scalar_lea.vmem %s1146_s3, %s676_s22 }
  0x15   : > { %v749_v1 = vld [vmem:[%s965_s25] sm:$0xff]   ;;  %v812_v2 = vld [vmem:[%s965_s25 + $0x8] sm:$0xff]   ;;  %v813_v3 = vld [vmem:[%s965_s25 + $0x10] sm:$0xff]  }
  0x16   : > { %v750_v4 = vunpack.c.l.bf16 %v749_v1  ;;  %v751_v5 = vunpack.c.h.bf16 %v749_v1  ;;  %v754_v6 = vunpack.c.l.bf16 %v812_v2  ;;  %v755_v7 = vunpack.c.h.bf16 %v812_v2  ;;  %v814_v8 = vld [vmem:[%s965_s25 + $0x18] sm:$0xff]   ;;  %v815_v22 = vld [vmem:[%s965_s25 + $0x20] sm:$0xff]   ;;  %v816_v47 = vld [vmem:[%s965_s25 + $0x28] sm:$0xff]  }
  0x17   : > { %v758_v10 = vunpack.c.l.bf16 %v813_v3  ;;  %v759_v11 = vunpack.c.h.bf16 %v813_v3  ;;  %v762_v12 = vunpack.c.l.bf16 %v814_v8  ;;  %v763_v13 = vunpack.c.h.bf16 %v814_v8  ;;  %v817_v52 = vld [vmem:[%s965_s25 + $0x30] sm:$0xff]   ;;  %v818_v57 = vld [vmem:[%s965_s25 + $0x38] sm:$0xff]  }
  0x18   : > { %v278_v14 = vmul.f32 %v750_v4, %v970_v0  ;;  %v279_v15 = vmul.f32 %v751_v5, %v970_v0  ;;  %v280_v16 = vmul.f32 %v754_v6, %v970_v0  ;;  %v281_v17 = vmul.f32 %v755_v7, %v970_v0 }
  0x19   : > { %v282_v18 = vmul.f32 %v758_v10, %v970_v0  ;;  %v283_v19 = vmul.f32 %v759_v11, %v970_v0  ;;  %v284_v20 = vmul.f32 %v762_v12, %v970_v0  ;;  %v285_v21 = vmul.f32 %v763_v13, %v970_v0 }
  0x1a   : > { %v317_v23 = vadd.f32 %v979_v9, %v278_v14  ;;  %v318_v24 = vadd.f32 %v979_v9, %v279_v15  ;;  %v319_v25 = vadd.f32 %v979_v9, %v280_v16  ;;  %v320_v26 = vadd.f32 %v979_v9, %v281_v17 }
  0x1b   : > { %v321_v27 = vadd.f32 %v979_v9, %v282_v18  ;;  %v322_v28 = vadd.f32 %v979_v9, %v283_v19  ;;  %v323_v29 = vadd.f32 %v979_v9, %v284_v20  ;;  %v324_v30 = vadd.f32 %v979_v9, %v285_v21 }
  0x1c   : > { %v349_v31 = vmul.f32 0.2, %v317_v23  ;;  %v350_v32 = vmul.f32 0.2, %v318_v24  ;;  %v351_v33 = vmul.f32 0.2, %v319_v25  ;;  %v766_v34 = vunpack.c.l.bf16 %v815_v22 }
  0x1d   : > { %v352_v35 = vmul.f32 0.2, %v320_v26  ;;  %v353_v36 = vmul.f32 0.2, %v321_v27  ;;  %v354_v37 = vmul.f32 0.2, %v322_v28  ;;  %v767_v38 = vunpack.c.h.bf16 %v815_v22 }
  0x1e   : > { %v381_v39 = vmax.f32 %v317_v23, %v349_v31  ;;  %v382_v40 = vmax.f32 %v318_v24, %v350_v32  ;;  %v383_v41 = vmax.f32 %v319_v25, %v351_v33  ;;  %v355_v42 = vmul.f32 0.2, %v323_v29  ;;  %v819_v24 = vld [vmem:[%s965_s25 + $0x40] sm:$0xff]  }
  0x1f   : > { %v384_v43 = vmax.f32 %v320_v26, %v352_v35  ;;  %v385_v44 = vmax.f32 %v321_v27, %v353_v36  ;;  %v386_v45 = vmax.f32 %v322_v28, %v354_v37  ;;  %v356_v46 = vmul.f32 0.2, %v324_v30  ;;  %v820_v37 = vld [vmem:[%s965_s25 + $0x48] sm:$0xff]  }
  0x20   : > { %v716_v48 = vpack.c.bf16 %v381_v39, %v381_v39  ;;  %v717_v49 = vpack.c.bf16 %v382_v40, %v382_v40  ;;  %v718_v50 = vpack.c.bf16 %v383_v41, %v383_v41  ;;  %v387_v51 = vmax.f32 %v323_v29, %v355_v42  ;;  %v821_v42 = vld [vmem:[%s965_s25 + $0x50] sm:$0xff]  }
  0x21   : > { %v719_v53 = vpack.c.bf16 %v384_v43, %v384_v43  ;;  %v720_v54 = vpack.c.bf16 %v385_v44, %v385_v44  ;;  %v721_v55 = vpack.c.bf16 %v386_v45, %v386_v45  ;;  %v388_v56 = vmax.f32 %v324_v30, %v356_v46 }
  0x22   : > { %542 = vst.msk [vmem:[%s1003_s5] sm:$0xf] %vm541_vm0, %v716_v48  ;;  %543 = vst.msk [vmem:[%s1003_s5 + $0x4] sm:$0xf] %vm541_vm0, %v717_v49  ;;  %v722_v58 = vpack.c.bf16 %v387_v51, %v387_v51  ;;  %v286_v59 = vmul.f32 %v766_v34, %v970_v0  ;;  %v287_v60 = vmul.f32 %v767_v38, %v970_v0  ;;  %v770_v61 = vunpack.c.l.bf16 %v816_v47 }
  0x23   : > { %544 = vst.msk [vmem:[%s1003_s5 + $0x8] sm:$0xf] %vm541_vm0, %v718_v50  ;;  %545 = vst.msk [vmem:[%s1003_s5 + $0xc] sm:$0xf] %vm541_vm0, %v719_v53  ;;  %v723_v62 = vpack.c.bf16 %v388_v56, %v388_v56  ;;  %v771_v63 = vunpack.c.h.bf16 %v816_v47  ;;  %v774_v1 = vunpack.c.l.bf16 %v817_v52  ;;  %v775_v2 = vunpack.c.h.bf16 %v817_v52  ;;  %v822_v47 = vld [vmem:[%s965_s25 + $0x58] sm:$0xff]  }
  0x24   : > { %546 = vst.msk [vmem:[%s1003_s5 + $0x10] sm:$0xf] %vm541_vm0, %v720_v54  ;;  %547 = vst.msk [vmem:[%s1003_s5 + $0x14] sm:$0xf] %vm541_vm0, %v721_v55  ;;  %v325_v3 = vadd.f32 %v979_v9, %v286_v59  ;;  %v326_v4 = vadd.f32 %v979_v9, %v287_v60  ;;  %v288_v5 = vmul.f32 %v770_v61, %v970_v0  ;;  %v778_v6 = vunpack.c.l.bf16 %v818_v57 }
  0x25   : > { %548 = vst.msk [vmem:[%s1003_s5 + $0x18] sm:$0xf] %vm541_vm0, %v722_v58  ;;  %549 = vst.msk [vmem:[%s1003_s5 + $0x1c] sm:$0xf] %vm541_vm0, %v723_v62  ;;  %v289_v7 = vmul.f32 %v771_v63, %v970_v0  ;;  %v290_v8 = vmul.f32 %v774_v1, %v970_v0  ;;  %v291_v10 = vmul.f32 %v775_v2, %v970_v0  ;;  %v779_v11 = vunpack.c.h.bf16 %v818_v57 }
  0x26   : > { %v357_v12 = vmul.f32 0.2, %v325_v3  ;;  %v358_v13 = vmul.f32 0.2, %v326_v4  ;;  %v327_v14 = vadd.f32 %v979_v9, %v288_v5  ;;  %v292_v15 = vmul.f32 %v778_v6, %v970_v0 }
  0x27   : > { %v328_v16 = vadd.f32 %v979_v9, %v289_v7  ;;  %v329_v17 = vadd.f32 %v979_v9, %v290_v8  ;;  %v330_v18 = vadd.f32 %v979_v9, %v291_v10  ;;  %v293_v19 = vmul.f32 %v779_v11, %v970_v0 }
  0x28   : > { %v389_v20 = vmax.f32 %v325_v3, %v357_v12  ;;  %v390_v21 = vmax.f32 %v326_v4, %v358_v13  ;;  %v359_v22 = vmul.f32 0.2, %v327_v14  ;;  %v331_v23 = vadd.f32 %v979_v9, %v292_v15 }
  0x29   : > { %v360_v25 = vmul.f32 0.2, %v328_v16  ;;  %v361_v26 = vmul.f32 0.2, %v329_v17  ;;  %v362_v27 = vmul.f32 0.2, %v330_v18  ;;  %v332_v28 = vadd.f32 %v979_v9, %v293_v19 }
  0x2a   : > { %v724_v29 = vpack.c.bf16 %v389_v20, %v389_v20  ;;  %v725_v30 = vpack.c.bf16 %v390_v21, %v390_v21  ;;  %v391_v31 = vmax.f32 %v327_v14, %v359_v22  ;;  %v363_v32 = vmul.f32 0.2, %v331_v23  ;;  %v823_v14 = vld [vmem:[%s965_s25 + $0x60] sm:$0xff]  }
  0x2b   : > { %v392_v33 = vmax.f32 %v328_v16, %v360_v25  ;;  %v393_v34 = vmax.f32 %v329_v17, %v361_v26  ;;  %v394_v35 = vmax.f32 %v330_v18, %v362_v27  ;;  %v364_v36 = vmul.f32 0.2, %v332_v28  ;;  %v824_v27 = vld [vmem:[%s965_s25 + $0x68] sm:$0xff]  }
  0x2c   : > { %550 = vst.msk [vmem:[%s1003_s5 + $0x20] sm:$0xf] %vm541_vm0, %v724_v29  ;;  %551 = vst.msk [vmem:[%s1003_s5 + $0x24] sm:$0xf] %vm541_vm0, %v725_v30  ;;  %v726_v38 = vpack.c.bf16 %v391_v31, %v391_v31  ;;  %v395_v39 = vmax.f32 %v331_v23, %v363_v32  ;;  %v782_v40 = vunpack.c.l.bf16 %v819_v24  ;;  %v783_v41 = vunpack.c.h.bf16 %v819_v24  ;;  %v825_v32 = vld [vmem:[%s965_s25 + $0x70] sm:$0xff]  }
  0x2d   : > { %v727_v43 = vpack.c.bf16 %v392_v33, %v392_v33  ;;  %v728_v44 = vpack.c.bf16 %v393_v34, %v393_v34  ;;  %v729_v45 = vpack.c.bf16 %v394_v35, %v394_v35  ;;  %v396_v46 = vmax.f32 %v332_v28, %v364_v36 }
  0x2e   : > { %552 = vst.msk [vmem:[%s1003_s5 + $0x28] sm:$0xf] %vm541_vm0, %v726_v38  ;;  %v730_v48 = vpack.c.bf16 %v395_v39, %v395_v39  ;;  %v294_v49 = vmul.f32 %v782_v40, %v970_v0  ;;  %v295_v50 = vmul.f32 %v783_v41, %v970_v0  ;;  %v786_v51 = vunpack.c.l.bf16 %v820_v37 }
  0x2f   : > { %553 = vst.msk [vmem:[%s1003_s5 + $0x2c] sm:$0xf] %vm541_vm0, %v727_v43  ;;  %554 = vst.msk [vmem:[%s1003_s5 + $0x30] sm:$0xf] %vm541_vm0, %v728_v44  ;;  %v731_v52 = vpack.c.bf16 %v396_v46, %v396_v46  ;;  %v787_v53 = vunpack.c.h.bf16 %v820_v37  ;;  %v790_v54 = vunpack.c.l.bf16 %v821_v42  ;;  %v791_v55 = vunpack.c.h.bf16 %v821_v42  ;;  %v826_v37 = vld [vmem:[%s965_s25 + $0x78] sm:$0xff]  }
  0x30   : > { %555 = vst.msk [vmem:[%s1003_s5 + $0x34] sm:$0xf] %vm541_vm0, %v729_v45  ;;  %556 = vst.msk [vmem:[%s1003_s5 + $0x38] sm:$0xf] %vm541_vm0, %v730_v48  ;;  %v333_v56 = vadd.f32 %v979_v9, %v294_v49  ;;  %v334_v57 = vadd.f32 %v979_v9, %v295_v50  ;;  %v296_v58 = vmul.f32 %v786_v51, %v970_v0  ;;  %v794_v59 = vunpack.c.l.bf16 %v822_v47 }
  0x31   : > { %557 = vst.msk [vmem:[%s1003_s5 + $0x3c] sm:$0xf] %vm541_vm0, %v731_v52  ;;  %v297_v60 = vmul.f32 %v787_v53, %v970_v0  ;;  %v298_v61 = vmul.f32 %v790_v54, %v970_v0  ;;  %v299_v62 = vmul.f32 %v791_v55, %v970_v0  ;;  %v795_v63 = vunpack.c.h.bf16 %v822_v47 }
  0x32   : > { %v365_v1 = vmul.f32 0.2, %v333_v56  ;;  %v366_v2 = vmul.f32 0.2, %v334_v57  ;;  %v335_v3 = vadd.f32 %v979_v9, %v296_v58  ;;  %v300_v4 = vmul.f32 %v794_v59, %v970_v0 }
  0x33   : > { %v336_v5 = vadd.f32 %v979_v9, %v297_v60  ;;  %v337_v6 = vadd.f32 %v979_v9, %v298_v61  ;;  %v338_v7 = vadd.f32 %v979_v9, %v299_v62  ;;  %v301_v8 = vmul.f32 %v795_v63, %v970_v0 }
  0x34   : > { %v397_v10 = vmax.f32 %v333_v56, %v365_v1  ;;  %v398_v11 = vmax.f32 %v334_v57, %v366_v2  ;;  %v367_v12 = vmul.f32 0.2, %v335_v3  ;;  %v339_v13 = vadd.f32 %v979_v9, %v300_v4 }
  0x35   : > { %v368_v15 = vmul.f32 0.2, %v336_v5  ;;  %v369_v16 = vmul.f32 0.2, %v337_v6  ;;  %v370_v17 = vmul.f32 0.2, %v338_v7  ;;  %v340_v18 = vadd.f32 %v979_v9, %v301_v8 }
  0x36   : > { %v732_v19 = vpack.c.bf16 %v397_v10, %v397_v10  ;;  %v733_v20 = vpack.c.bf16 %v398_v11, %v398_v11  ;;  %v399_v21 = vmax.f32 %v335_v3, %v367_v12  ;;  %v371_v22 = vmul.f32 0.2, %v339_v13 }
  0x37   : > { %v400_v23 = vmax.f32 %v336_v5, %v368_v15  ;;  %v401_v24 = vmax.f32 %v337_v6, %v369_v16  ;;  %v402_v25 = vmax.f32 %v338_v7, %v370_v17  ;;  %v372_v26 = vmul.f32 0.2, %v340_v18 }
  0x38   : > { %558 = vst.msk [vmem:[%s1003_s5 + $0x40] sm:$0xf] %vm541_vm0, %v732_v19  ;;  %559 = vst.msk [vmem:[%s1003_s5 + $0x44] sm:$0xf] %vm541_vm0, %v733_v20  ;;  %v734_v28 = vpack.c.bf16 %v399_v21, %v399_v21  ;;  %v403_v29 = vmax.f32 %v339_v13, %v371_v22  ;;  %v798_v30 = vunpack.c.l.bf16 %v823_v14  ;;  %v799_v31 = vunpack.c.h.bf16 %v823_v14 }
  0x39   : > { %v735_v33 = vpack.c.bf16 %v400_v23, %v400_v23  ;;  %v736_v34 = vpack.c.bf16 %v401_v24, %v401_v24  ;;  %v737_v35 = vpack.c.bf16 %v402_v25, %v402_v25  ;;  %v404_v36 = vmax.f32 %v340_v18, %v372_v26 }
  0x3a   : > { %560 = vst.msk [vmem:[%s1003_s5 + $0x48] sm:$0xf] %vm541_vm0, %v734_v28  ;;  %v738_v38 = vpack.c.bf16 %v403_v29, %v403_v29  ;;  %v302_v39 = vmul.f32 %v798_v30, %v970_v0  ;;  %v303_v40 = vmul.f32 %v799_v31, %v970_v0  ;;  %v802_v41 = vunpack.c.l.bf16 %v824_v27 }
  0x3b   : > { %561 = vst.msk [vmem:[%s1003_s5 + $0x4c] sm:$0xf] %vm541_vm0, %v735_v33  ;;  %562 = vst.msk [vmem:[%s1003_s5 + $0x50] sm:$0xf] %vm541_vm0, %v736_v34  ;;  %v739_v42 = vpack.c.bf16 %v404_v36, %v404_v36  ;;  %v803_v43 = vunpack.c.h.bf16 %v824_v27  ;;  %v806_v44 = vunpack.c.l.bf16 %v825_v32  ;;  %v807_v45 = vunpack.c.h.bf16 %v825_v32 }
  0x3c   : > { %563 = vst.msk [vmem:[%s1003_s5 + $0x54] sm:$0xf] %vm541_vm0, %v737_v35  ;;  %564 = vst.msk [vmem:[%s1003_s5 + $0x58] sm:$0xf] %vm541_vm0, %v738_v38  ;;  %v341_v46 = vadd.f32 %v979_v9, %v302_v39  ;;  %v342_v47 = vadd.f32 %v979_v9, %v303_v40  ;;  %v304_v48 = vmul.f32 %v802_v41, %v970_v0  ;;  %v810_v49 = vunpack.c.l.bf16 %v826_v37 }
  0x3d   : > { %565 = vst.msk [vmem:[%s1003_s5 + $0x5c] sm:$0xf] %vm541_vm0, %v739_v42  ;;  %v305_v50 = vmul.f32 %v803_v43, %v970_v0  ;;  %v306_v51 = vmul.f32 %v806_v44, %v970_v0  ;;  %v307_v52 = vmul.f32 %v807_v45, %v970_v0  ;;  %v811_v53 = vunpack.c.h.bf16 %v826_v37 }
  0x3e   : > { %v373_v54 = vmul.f32 0.2, %v341_v46  ;;  %v374_v55 = vmul.f32 0.2, %v342_v47  ;;  %v343_v56 = vadd.f32 %v979_v9, %v304_v48  ;;  %v308_v57 = vmul.f32 %v810_v49, %v970_v0 }
  0x3f   : > { %v344_v58 = vadd.f32 %v979_v9, %v305_v50  ;;  %v345_v59 = vadd.f32 %v979_v9, %v306_v51  ;;  %v346_v60 = vadd.f32 %v979_v9, %v307_v52  ;;  %v309_v61 = vmul.f32 %v811_v53, %v970_v0 }
  0x40   : > { %v405_v62 = vmax.f32 %v341_v46, %v373_v54  ;;  %v406_v63 = vmax.f32 %v342_v47, %v374_v55  ;;  %v375_v1 = vmul.f32 0.2, %v343_v56  ;;  %v347_v2 = vadd.f32 %v979_v9, %v308_v57 }
  0x41   : > { %v376_v3 = vmul.f32 0.2, %v344_v58  ;;  %v377_v4 = vmul.f32 0.2, %v345_v59  ;;  %v378_v5 = vmul.f32 0.2, %v346_v60  ;;  %v348_v6 = vadd.f32 %v979_v9, %v309_v61 }
  0x42   : > { %v740_v7 = vpack.c.bf16 %v405_v62, %v405_v62  ;;  %v741_v8 = vpack.c.bf16 %v406_v63, %v406_v63  ;;  %v407_v10 = vmax.f32 %v343_v56, %v375_v1  ;;  %v379_v11 = vmul.f32 0.2, %v347_v2 }
  0x43   : > { %v408_v0 = vmax.f32 %v344_v58, %v376_v3  ;;  %v409_v12 = vmax.f32 %v345_v59, %v377_v4  ;;  %v410_v13 = vmax.f32 %v346_v60, %v378_v5  ;;  %v380_v14 = vmul.f32 0.2, %v348_v6 }
  0x44   : > { %566 = vst.msk [vmem:[%s1003_s5 + $0x60] sm:$0xf] %vm541_vm0, %v740_v7  ;;  %567 = vst.msk [vmem:[%s1003_s5 + $0x64] sm:$0xf] %vm541_vm0, %v741_v8  ;;  %v742_v15 = vpack.c.bf16 %v407_v10, %v407_v10  ;;  %v411_v9 = vmax.f32 %v347_v2, %v379_v11 }
  0x45   : > { %v743_v16 = vpack.c.bf16 %v408_v0, %v408_v0  ;;  %v744_v17 = vpack.c.bf16 %v409_v12, %v409_v12  ;;  %v745_v18 = vpack.c.bf16 %v410_v13, %v410_v13  ;;  %v412_v19 = vmax.f32 %v348_v6, %v380_v14 }
  0x46   : > { %568 = vst.msk [vmem:[%s1003_s5 + $0x68] sm:$0xf] %vm541_vm0, %v742_v15  ;;  %v746_v20 = vpack.c.bf16 %v411_v9, %v411_v9 }
  0x47   : > { %569 = vst.msk [vmem:[%s1003_s5 + $0x6c] sm:$0xf] %vm541_vm0, %v743_v16  ;;  %570 = vst.msk [vmem:[%s1003_s5 + $0x70] sm:$0xf] %vm541_vm0, %v744_v17  ;;  %v747_v21 = vpack.c.bf16 %v412_v19, %v412_v19 }
  0x48   : > { %571 = vst.msk [vmem:[%s1003_s5 + $0x74] sm:$0xf] %vm541_vm0, %v745_v18  ;;  %572 = vst.msk [vmem:[%s1003_s5 + $0x78] sm:$0xf] %vm541_vm0, %v746_v20 }
  0x49   : > { %573 = vst.msk [vmem:[%s1003_s5 + $0x7c] sm:$0xf] %vm541_vm0, %v747_v21 }
  0x4a PF: > { %s13_s16 = sadd.s32 1, %s905_s16   ;;  %s1147_s12 = smov %s897_s14 }
  0x4b   : > { %p10_p7 = scmp.ge.s32.totalorder %s13_s16, 6   ;;  %s1148_s13 = smov %s901_s15 }
  0x4c   : > { %s1149_s14 = smov %s1152_s17  ;;  %s1150_s15 = smov %s1156_s18 }
  0x4d   :  { %12 = sbr.rel (!%p10_p7) target bundleno = 3 (0x3), region = 62 }

// kernel: dcgan_upconv_forward.2
= control target key start
LH: loop header
LB: loop body
LE: loop exit
PB: predicated region body
PF: predicated region fallthrough
CT: control target
= control target key end

     0   :  { %s2885_s15 = smov 0   ;;  %s3668_s0 = inlined_call_operand.vmem [shape: bf16[2,18,16,12], index: 0, kind: input, shape index: {}]   ;;  %s3669_s1 = inlined_call_operand.vmem [shape: bf16[2,2,12,16], index: 1, kind: input, shape index: {}]   ;;  %s3670_s2 = inlined_call_operand.vmem [shape: bf16[2,2,256,16], index: 2, kind: output, shape index: {0}]   ;;  %s3671_s3 = inlined_call_operand.vmem [shape: f32[2,1,16], index: 3, kind: output, shape index: {1}]   ;;  %s3672_s4 = inlined_call_operand.vmem [shape: f32[2,1,16], index: 4, kind: output, shape index: {2}]  }
   0x1 LB: > { %s2162_s16 = sadd.s32 4294967295, %s2858_s15   ;;  %p2166_p0 = scmp.ge.s32.totalorder %s2858_s15, 1  ;;  %s2858_s15 = sphi %s2885_s15, %s15_s15  }
   0x2   : > { %p167_p1 = scmp.lt.s32.totalorder %s2858_s15, 3 }
   0x4   : > { %p168_p2 = pnand %p2166_p0, %p167_p1 }
   0x5   : > { %v2800_v0 = vld [vmem:[%s3669_s1 + $0x8] sm:$0x3f] (!%p168_p2)   ;;  %vm453_vm0 = vcmask (!%p168_p2), 1045504   ;;  %p199_p3 = scmp.lt.s32.totalorder (!%p168_p2), %s2162_s16, 1  ;;  %v2801_v1 = vld [vmem:[%s3669_s1 + $0x18] sm:$0x3f] (!%p168_p2)  }
   0x6   : > { %171 = sbr.rel (%p168_p2) target bundleno = 408 (0x198), region = 28  ;;  %2787 = vmatprep.subr.msk.bf16.mxu0 (!%p168_p2), %vm453_vm0, %v2800_v0  ;;  %v455_v2 = vsel (!%p168_p2), %vm453_vm0, %v2800_v0, 0  ;;  %v2803_v3 = vld [vmem:[%s3669_s1] sm:$0x3f] (!%p168_p2)   ;;  %2789 = vmatprep.subr.msk.bf16.mxu1 (!%p168_p2), %vm453_vm0, %v2801_v1  ;;  %v1261_v4 = vsel (!%p168_p2), %vm453_vm0, %v2801_v1, 0  ;;  %vm404_vm1 = vcmask (!%p168_p2), 97280  }
   0x7   : > { %2588 = vmatpush3.bf16.msra.mxu0 (!%p168_p2), %v455_v2  ;;  %2656 = vmatpush3.bf16.msra.mxu1 (!%p168_p2), %v1261_v4  ;;  %v2805_v5 = vld [vmem:[%s3669_s1 + $0x10] sm:$0x3f] (!%p168_p2)   ;;  %v752_v9 = vsel (!%p168_p2), %vm453_vm0, %v2803_v3, 0  ;;  %vm915_vm2 = vcmask (!%p168_p2), 130048   ;;  %vm1216_vm3 = vcmask (!%p168_p2), 125952   ;;  %vm2054_vm4 = vcmask (!%p168_p2), 122880  }
   0x8   : > { %2788 = vmatprep.subr.msk.bf16.mxu0 (!%p168_p2), %vm453_vm0, %v2803_v3  ;;  %2790 = vmatprep.subr.msk.bf16.mxu1 (!%p168_p2), %vm453_vm0, %v2805_v5  ;;  %v1558_v11 = vsel (!%p168_p2), %vm453_vm0, %v2805_v5, 0 }
   0xd   : > { %s3674_s16 = smov (!%p199_p3, %s2162_s16), 1 }
   0xe   : > { %s2791_s23 = smul.u32 144, %s3674_s16  ;;  %s2454_s29 = sshll.u32 %s3674_s16, 8 }
   0xf   : > { %s3049_s6 = scalar_lea.vmem %s3670_s2, %s2454_s29  ;;  %s211_s9 = scalar_lea.vmem %s3671_s3, %s3674_s16 }
  0x10   : > { %s2916_s28 = scalar_lea.vmem %s3668_s0, %s2791_s23  ;;  %s214_s12 = scalar_lea.vmem %s3672_s4, %s3674_s16 }
  0x11   : > { %v2802_v6 = vld [vmem:[%s2916_s28] sm:$0xff]   ;;  %v2921_v7 = vld [vmem:[%s2916_s28 + $0x8] sm:$0xff]   ;;  %v2929_v10 = vld [vmem:[%s2916_s28 + $0x10] sm:$0xff]  }
  0x12   : > { %2589 = vmatprep.mubr.msk.bf16.mxu0 %vm404_vm1, %v2802_v6  ;;  %v2806_v8 = vld [vmem:[%s2916_s28 + $0x8] sm:$0xff]   ;;  %2657 = vmatprep.mubr.msk.bf16.mxu1 %vm404_vm1, %v2921_v7  ;;  %v2808_v12 = vld [vmem:[%s2916_s28 + $0x10] sm:$0xff]   ;;  %v2937_v13 = vld [vmem:[%s2916_s28 + $0x18] sm:$0xff]  }
  0x13   : > { %2590 = vmatmul.mubr.msk.bf16.vlgmr.msra.gmra.mrb[0].mxu0 %vm404_vm1, %v2806_v8  ;;  %2658 = vmatmul.mubr.msk.bf16.vlgmr.msra.gmra.mrb[0].mxu1 %vm404_vm1, %v2929_v10  ;;  %v2810_v14 = vld [vmem:[%s2916_s28 + $0x18] sm:$0xff]   ;;  %v2811_v15 = vld [vmem:[%s2916_s28 + $0x20] sm:$0xff]   ;;  %v2813_v17 = vld [vmem:[%s2916_s28 + $0x28] sm:$0xff]  }
  0x14   : > { %2622 = vmatpush3.bf16.msra.mxu0 %v752_v9  ;;  %2690 = vmatpush3.bf16.msra.mxu1 %v1558_v11  ;;  %v2812_v16 = vld [vmem:[%s2916_s28 + $0x20] sm:$0xff]   ;;  %v2814_v18 = vld [vmem:[%s2916_s28 + $0x28] sm:$0xff]   ;;  %v2815_v19 = vld [vmem:[%s2916_s28 + $0x30] sm:$0xff]  }
  0x15   : > { %2593 = vmatprep.mubr.msk.bf16.mxu0 %vm404_vm1, %v2808_v12  ;;  %2661 = vmatprep.mubr.msk.bf16.mxu1 %vm404_vm1, %v2937_v13  ;;  %v2816_v20 = vld [vmem:[%s2916_s28 + $0x30] sm:$0xff]   ;;  %v2817_v21 = vld [vmem:[%s2916_s28 + $0x38] sm:$0xff]   ;;  %v2819_v23 = vld [vmem:[%s2916_s28 + $0x40] sm:$0xff]  }
  0x16   : > { %v2818_v22 = vld [vmem:[%s2916_s28 + $0x38] sm:$0xff]   ;;  %v2820_v24 = vld [vmem:[%s2916_s28 + $0x40] sm:$0xff]   ;;  %v2821_v25 = vld [vmem:[%s2916_s28 + $0x48] sm:$0xff]  }
  0x17   : > { %v2822_v26 = vld [vmem:[%s2916_s28 + $0x48] sm:$0xff]   ;;  %v2823_v27 = vld [vmem:[%s2916_s28 + $0x50] sm:$0xff]   ;;  %v2825_v29 = vld [vmem:[%s2916_s28 + $0x58] sm:$0xff]  }
  0x18   : > { %v2824_v28 = vld [vmem:[%s2916_s28 + $0x50] sm:$0xff]   ;;  %v2826_v30 = vld [vmem:[%s2916_s28 + $0x58] sm:$0xff]   ;;  %v2827_v31 = vld [vmem:[%s2916_s28 + $0x60] sm:$0xff]  }
  0x19   : > { %v2828_v32 = vld [vmem:[%s2916_s28 + $0x60] sm:$0xff]   ;;  %v2829_v33 = vld [vmem:[%s2916_s28 + $0x68] sm:$0xff]   ;;  %v2831_v35 = vld [vmem:[%s2916_s28 + $0x70] sm:$0xff]  }
  0x1a   : > { %v2830_v34 = vld [vmem:[%s2916_s28 + $0x68] sm:$0xff]   ;;  %v2832_v36 = vld [vmem:[%s2916_s28 + $0x70] sm:$0xff]   ;;  %v2833_v37 = vld [vmem:[%s2916_s28 + $0x78] sm:$0xff]  }
  0x1b   : > { %2594 = vmatmul.mubr.msk.bf16.gmra.mrb[4].mxu0 %vm404_vm1, %v2810_v14  ;;  %2662 = vmatmul.mubr.msk.bf16.gmra.mrb[4].mxu1 %vm404_vm1, %v2811_v15  ;;  %v2834_v38 = vld [vmem:[%s2916_s28 + $0x78] sm:$0xff]   ;;  %v2835_v39 = vld [vmem:[%s2916_s28 + $0x80] sm:$0xff]   ;;  %v2836_v40 = vld [vmem:[%s2916_s28 + $0x10] sm:$0xff]  }
  0x1c   : > { %2597 = vmatprep.mubr.msk.bf16.mxu0 %vm404_vm1, %v2812_v16  ;;  %2665 = vmatprep.mubr.msk.bf16.mxu1 %vm404_vm1, %v2813_v17  ;;  %v2837_v41 = vld [vmem:[%s2916_s28 + $0x18] sm:$0xff]   ;;  %v2838_v42 = vld [vmem:[%s2916_s28 + $0x20] sm:$0xff]   ;;  %v2839_v43 = vld [vmem:[%s2916_s28 + $0x28] sm:$0xff]  }
  0x1d   : > { %v2840_v44 = vld [vmem:[%s2916_s28 + $0x30] sm:$0xff]   ;;  %v2841_v45 = vld [vmem:[%s2916_s28 + $0x38] sm:$0xff]   ;;  %v2842_v46 = vld [vmem:[%s2916_s28 + $0x40] sm:$0xff]  }
  0x1e   : > { %v2843_v47 = vld [vmem:[%s2916_s28 + $0x48] sm:$0xff]   ;;  %v2844_v48 = vld [vmem:[%s2916_s28 + $0x50] sm:$0xff]   ;;  %v2845_v49 = vld [vmem:[%s2916_s28 + $0x58] sm:$0xff]  }
  0x1f   : > { %v2846_v50 = vld [vmem:[%s2916_s28 + $0x60] sm:$0xff]   ;;  %v2847_v51 = vld [vmem:[%s2916_s28 + $0x68] sm:$0xff]   ;;  %v2848_v52 = vld [vmem:[%s2916_s28 + $0x70] sm:$0xff]  }
  0x20   : > { %v2849_v53 = vld [vmem:[%s2916_s28 + $0x78] sm:$0xff]   ;;  %v2850_v54 = vld [vmem:[%s2916_s28 + $0x80] sm:$0xff]   ;;  %v2851_v55 = vld [vmem:[%s2916_s28 + $0x88] sm:$0xff]  }
  0x23   : > { %2598 = vmatmul.mubr.msk.bf16.gmra.mrb[8].mxu0 %vm404_vm1, %v2814_v18  ;;  %2666 = vmatmul.mubr.msk.bf16.gmra.mrb[8].mxu1 %vm404_vm1, %v2815_v19 }
  0x24   : > { %2601 = vmatprep.mubr.msk.bf16.mxu0 %vm404_vm1, %v2816_v20  ;;  %2669 = vmatprep.mubr.msk.bf16.mxu1 %vm404_vm1, %v2817_v21 }
  0x2b   : > { %2602 = vmatmul.mubr.msk.bf16.gmra.mrb[12].mxu0 %vm404_vm1, %v2818_v22  ;;  %2670 = vmatmul.mubr.msk.bf16.gmra.mrb[12].mxu1 %vm404_vm1, %v2819_v23 }
  0x2c   : > { %2605 = vmatprep.mubr.msk.bf16.mxu0 %vm404_vm1, %v2820_v24  ;;  %2673 = vmatprep.mubr.msk.bf16.mxu1 %vm404_vm1, %v2821_v25 }
  0x33   : > { %2606 = vmatmul.mubr.msk.bf16.gmra.mrb[16].mxu0 %vm404_vm1, %v2822_v26  ;;  %2674 = vmatmul.mubr.msk.bf16.gmra.mrb[16].mxu1 %vm404_vm1, %v2823_v27 }
  0x34   : > { %2609 = vmatprep.mubr.msk.bf16.mxu0 %vm404_vm1, %v2824_v28  ;;  %2677 = vmatprep.mubr.msk.bf16.mxu1 %vm404_vm1, %v2825_v29 }
  0x3b   : > { %2610 = vmatmul.mubr.msk.bf16.gmra.mrb[20].mxu0 %vm404_vm1, %v2826_v30  ;;  %2678 = vmatmul.mubr.msk.bf16.gmra.mrb[20].mxu1 %vm404_vm1, %v2827_v31 }
  0x3c   : > { %2613 = vmatprep.mubr.msk.bf16.mxu0 %vm404_vm1, %v2828_v32  ;;  %2681 = vmatprep.mubr.msk.bf16.mxu1 %vm404_vm1, %v2829_v33 }
  0x43   : > { %2614 = vmatmul.mubr.msk.bf16.gmra.mrb[24].mxu0 %vm404_vm1, %v2830_v34  ;;  %2682 = vmatmul.mubr.msk.bf16.gmra.mrb[24].mxu1 %vm404_vm1, %v2831_v35 }
  0x44   : > { %2617 = vmatprep.mubr.msk.bf16.mxu0 %vm404_vm1, %v2832_v36  ;;  %2685 = vmatprep.mubr.msk.bf16.mxu1 %vm404_vm1, %v2833_v37 }
  0x4b   : > { %2618 = vmatmul.mubr.msk.bf16.gmra.mrb[28].mxu0 %vm404_vm1, %v2834_v38  ;;  %2686 = vmatmul.mubr.msk.bf16.gmra.mrb[28].mxu1 %vm404_vm1, %v2835_v39 }
  0x4c   : > { %2623 = vmatprep.mubr.msk.bf16.mxu0 %vm404_vm1, %v2921_v7  ;;  %2691 = vmatprep.mubr.msk.bf16.mxu1 %vm404_vm1, %v2836_v40 }
  0x53   : > { %2624 = vmatmul.mubr.msk.bf16.vlgmr.msra.gmra.mrb[0].mxu0 %vm404_vm1, %v2929_v10  ;;  %2692 = vmatmul.mubr.msk.bf16.vlgmr.msra.gmra.mrb[0].mxu1 %vm404_vm1, %v2837_v41 }
  0x54   : > { %2627 = vmatprep.mubr.msk.bf16.mxu0 %vm404_vm1, %v2937_v13  ;;  %2695 = vmatprep.mubr.msk.bf16.mxu1 %vm404_vm1, %v2838_v42 }
  0x5b   : > { %2628 = vmatmul.mubr.msk.bf16.gmra.mrb[4].mxu0 %vm404_vm1, %v2811_v15  ;;  %2696 = vmatmul.mubr.msk.bf16.gmra.mrb[4].mxu1 %vm404_vm1, %v2839_v43 }
  0x5c   : > { %2631 = vmatprep.mubr.msk.bf16.mxu0 %vm404_vm1, %v2813_v17  ;;  %2699 = vmatprep.mubr.msk.bf16.mxu1 %vm404_vm1, %v2840_v44 }
  0x63   : > { %2632 = vmatmul.mubr.msk.bf16.gmra.mrb[8].mxu0 %vm404_vm1, %v2815_v19  ;;  %2700 = vmatmul.mubr.msk.bf16.gmra.mrb[8].mxu1 %vm404_vm1, %v2841_v45 }
  0x64   : > { %2635 = vmatprep.mubr.msk.bf16.mxu0 %vm404_vm1, %v2817_v21  ;;  %2703 = vmatprep.mubr.msk.bf16.mxu1 %vm404_vm1, %v2842_v46 }
  0x6b   : > { %2636 = vmatmul.mubr.msk.bf16.gmra.mrb[12].mxu0 %vm404_vm1, %v2819_v23  ;;  %2704 = vmatmul.mubr.msk.bf16.gmra.mrb[12].mxu1 %vm404_vm1, %v2843_v47 }
  0x6c   : > { %2639 = vmatprep.mubr.msk.bf16.mxu0 %vm404_vm1, %v2821_v25  ;;  %2707 = vmatprep.mubr.msk.bf16.mxu1 %vm404_vm1, %v2844_v48 }
  0x73   : > { %2640 = vmatmul.mubr.msk.bf16.gmra.mrb[16].mxu0 %vm404_vm1, %v2823_v27  ;;  %2708 = vmatmul.mubr.msk.bf16.gmra.mrb[16].mxu1 %vm404_vm1, %v2845_v49 }
  0x74   : > { %2643 = vmatprep.mubr.msk.bf16.mxu0 %vm404_vm1, %v2825_v29  ;;  %2711 = vmatprep.mubr.msk.bf16.mxu1 %vm404_vm1, %v2846_v50 }
  0x7b   : > { %2644 = vmatmul.mubr.msk.bf16.gmra.mrb[20].mxu0 %vm404_vm1, %v2827_v31  ;;  %2712 = vmatmul.mubr.msk.bf16.gmra.mrb[20].mxu1 %vm404_vm1, %v2847_v51 }
  0x7c   : > { %2647 = vmatprep.mubr.msk.bf16.mxu0 %vm404_vm1, %v2829_v33  ;;  %2715 = vmatprep.mubr.msk.bf16.mxu1 %vm404_vm1, %v2848_v52 }
  0x83   : > { %2648 = vmatmul.mubr.msk.bf16.gmra.mrb[24].mxu0 %vm404_vm1, %v2831_v35  ;;  %2716 = vmatmul.mubr.msk.bf16.gmra.mrb[24].mxu1 %vm404_vm1, %v2849_v53 }
  0x84   : > { %2651 = vmatprep.mubr.msk.bf16.mxu0 %vm404_vm1, %v2833_v37  ;;  %2719 = vmatprep.mubr.msk.bf16.mxu1 %vm404_vm1, %v2850_v54 }
  0x8b   : > { %2652 = vmatmul.mubr.msk.bf16.gmra.mrb[28].mxu0 %vm404_vm1, %v2835_v39  ;;  %2720 = vmatmul.mubr.msk.bf16.gmra.mrb[28].mxu1 %vm404_vm1, %v2851_v55 }
 0x126   : > { %v2625_v56 = vpop.f32.mrb[0].mxu0  ;;  %v2693_v59 = vpop.f32.mrb[0].mxu1 }
 0x127   : > { %v988_v57 = vmul.f32 %v2625_v56, %v2625_v56  ;;  %v2457_v58 = vpack.c.bf16 %v2625_v56, %v2625_v56  ;;  %v788_v60 = vpop.f32.mrb[1].mxu0  ;;  %v1793_v61 = vmul.f32 %v2693_v59, %v2693_v59  ;;  %v2489_v62 = vpack.c.bf16 %v2693_v59, %v2693_v59  ;;  %v1594_v63 = vpop.f32.mrb[1].mxu1 }
 0x128   : > { %v2626_v0 = vpop.f32.mrb[2].mxu0  ;;  %v919_v1 = vsel %vm915_vm2, %v2625_v56, 0.0  ;;  %v2455_v2 = vpack.c.bf16 %v788_v60, %v788_v60  ;;  %v2694_v3 = vpop.f32.mrb[2].mxu1  ;;  %v1724_v6 = vsel %vm915_vm2, %v2693_v59, 0.0  ;;  %v916_v7 = vsel %vm915_vm2, %v788_v60, 0.0 }
 0x129   : > { %1219 = vst.msk [vmem:[%s3049_s6 + $0x8] sm:$0xf] %vm1216_vm3, %v2457_v58  ;;  %v791_v4 = vpop.f32.mrb[3].mxu0  ;;  %v1021_v5 = vsel %vm915_vm2, %v988_v57, 0.0  ;;  %2422 = vst.msk [vmem:[%s3049_s6 + $0x88] sm:$0xf] %vm1216_vm3, %v2489_v62  ;;  %v2487_v8 = vpack.c.bf16 %v1594_v63, %v1594_v63  ;;  %v986_v11 = vmul.f32 %v788_v60, %v788_v60  ;;  %v2458_v13 = vpack.c.bf16 %v2626_v0, %v2626_v0 }
 0x12a   : > { %v1597_v9 = vpop.f32.mrb[3].mxu1  ;;  %v1826_v10 = vsel %vm915_vm2, %v1793_v61, 0.0  ;;  %1217 = vst.msk [vmem:[%s3049_s6] sm:$0xf] %vm1216_vm3, %v2455_v2  ;;  %v1721_v12 = vsel %vm915_vm2, %v1594_v63, 0.0  ;;  %v1791_v14 = vmul.f32 %v1594_v63, %v1594_v63  ;;  %v921_v15 = vsel %vm915_vm2, %v2626_v0, 0.0 }
 0x12b   : > { %2420 = vst.msk [vmem:[%s3049_s6 + $0x80] sm:$0xf] %vm1216_vm3, %v2487_v8  ;;  %v2490_v16 = vpack.c.bf16 %v2694_v3, %v2694_v3  ;;  %v917_v17 = vsel %vm915_vm2, %v791_v4, 0.0  ;;  %v989_v18 = vmul.f32 %v2626_v0, %v2626_v0  ;;  %1220 = vst.msk [vmem:[%s3049_s6 + $0xc] sm:$0xf] %vm1216_vm3, %v2458_v13  ;;  %v987_v20 = vmul.f32 %v791_v4, %v791_v4 }
 0x12c   : > { %v918_v19 = vadd.f32 %v917_v17, %v916_v7  ;;  %v2456_v21 = vpack.c.bf16 %v791_v4, %v791_v4  ;;  %v1794_v22 = vmul.f32 %v2694_v3, %v2694_v3  ;;  %v1722_v23 = vsel %vm915_vm2, %v1597_v9, 0.0 }
 0x12d   : > { %2423 = vst.msk [vmem:[%s3049_s6 + $0x8c] sm:$0xf] %vm1216_vm3, %v2490_v16  ;;  %v1792_v24 = vmul.f32 %v1597_v9, %v1597_v9  ;;  %v2488_v25 = vpack.c.bf16 %v1597_v9, %v1597_v9  ;;  %v1018_v27 = vsel %vm915_vm2, %v986_v11, 0.0  ;;  %v1019_v29 = vsel %vm915_vm2, %v987_v20, 0.0 }
 0x12e   : > { %v2629_v26 = vpop.f32.mrb[4].mxu0  ;;  %v920_v28 = vadd.f32 %v919_v1, %v918_v19  ;;  %1218 = vst.msk [vmem:[%s3049_s6 + $0x4] sm:$0xf] %vm1216_vm3, %v2456_v21  ;;  %v1723_v30 = vadd.f32 %v1722_v23, %v1721_v12  ;;  %v2697_v31 = vpop.f32.mrb[4].mxu1  ;;  %v1823_v33 = vsel %vm915_vm2, %v1791_v14, 0.0  ;;  %v1020_v34 = vadd.f32 %v1019_v29, %v1018_v27 }
 0x12f   : > { %v804_v32 = vpop.f32.mrb[5].mxu0  ;;  %v1824_v35 = vsel %vm915_vm2, %v1792_v24, 0.0  ;;  %2421 = vst.msk [vmem:[%s3049_s6 + $0x84] sm:$0xf] %vm1216_vm3, %v2488_v25  ;;  %v2461_v36 = vpack.c.bf16 %v2629_v26, %v2629_v26  ;;  %v1610_v37 = vpop.f32.mrb[5].mxu1  ;;  %v1023_v39 = vsel %vm915_vm2, %v989_v18, 0.0  ;;  %v2493_v47 = vpack.c.bf16 %v2697_v31, %v2697_v31 }
 0x130   : > { %v3080_v38 = vpop.f32.mrb[6].mxu0  ;;  %v1726_v40 = vsel %vm915_vm2, %v2694_v3, 0.0  ;;  %v1725_v41 = vadd.f32 %v1724_v6, %v1723_v30  ;;  %v1825_v42 = vadd.f32 %v1824_v35, %v1823_v33  ;;  %v3084_v43 = vpop.f32.mrb[6].mxu1  ;;  %v1828_v45 = vsel %vm915_vm2, %v1794_v22, 0.0 }
 0x131   : > { %v807_v44 = vpop.f32.mrb[7].mxu0  ;;  %v1022_v46 = vadd.f32 %v1021_v5, %v1020_v34  ;;  %1223 = vst.msk [vmem:[%s3049_s6 + $0x18] sm:$0xf] %vm1216_vm3, %v2461_v36  ;;  %v922_v48 = vadd.f32 %v921_v15, %v920_v28  ;;  %v1613_v49 = vpop.f32.mrb[7].mxu1  ;;  %v992_v51 = vmul.f32 %v2629_v26, %v2629_v26  ;;  %v923_v52 = vsel %vm915_vm2, %v804_v32, 0.0 }
 0x132   : > { %v1827_v50 = vadd.f32 %v1826_v10, %v1825_v42  ;;  %v990_v53 = vmul.f32 %v804_v32, %v804_v32  ;;  %2426 = vst.msk [vmem:[%s3049_s6 + $0x98] sm:$0xf] %vm1216_vm3, %v2493_v47  ;;  %v2459_v56 = vpack.c.bf16 %v804_v32, %v804_v32  ;;  %v1727_v57 = vadd.f32 %v1726_v40, %v1725_v41 }
 0x133   : > { %v924_v54 = vadd.f32 %v923_v52, %v922_v48  ;;  %v1024_v55 = vadd.f32 %v1023_v39, %v1022_v46  ;;  %v1728_v59 = vsel %vm915_vm2, %v1610_v37, 0.0  ;;  %v1795_v60 = vmul.f32 %v1610_v37, %v1610_v37 }
 0x134   : > { %v1025_v58 = vsel %vm915_vm2, %v990_v53, 0.0  ;;  %v1829_v61 = vadd.f32 %v1828_v45, %v1827_v50  ;;  %v927_v62 = vsel %vm915_vm2, %v2629_v26, 0.0  ;;  %1221 = vst.msk [vmem:[%s3049_s6 + $0x10] sm:$0xf] %vm1216_vm3, %v2459_v56  ;;  %v1729_v0 = vadd.f32 %v1728_v59, %v1727_v57 }
 0x135   : > { %v1026_v63 = vadd.f32 %v1025_v58, %v1024_v55  ;;  %v2491_v1 = vpack.c.bf16 %v1610_v37, %v1610_v37  ;;  %v1732_v3 = vsel %vm915_vm2, %v2697_v31, 0.0  ;;  %v1797_v4 = vmul.f32 %v2697_v31, %v2697_v31 }
 0x136   : > { %v3097_v2 = vpop.f32.mrb[8].mxu0  ;;  %v1830_v5 = vsel %vm915_vm2, %v1795_v60, 0.0  ;;  %v2462_v6 = vpack.c.bf16 %v3080_v38, %v3080_v38  ;;  %v3103_v7 = vpop.f32.mrb[8].mxu1  ;;  %v1029_v9 = vsel %vm915_vm2, %v992_v51, 0.0  ;;  %v2494_v11 = vpack.c.bf16 %v3084_v43, %v3084_v43 }
 0x137   : > { %v3105_v8 = vpop.f32.mrb[9].mxu0  ;;  %v1831_v10 = vadd.f32 %v1830_v5, %v1829_v61  ;;  %2424 = vst.msk [vmem:[%s3049_s6 + $0x90] sm:$0xf] %vm1216_vm3, %v2491_v1  ;;  %v925_v12 = vsel %vm915_vm2, %v807_v44, 0.0  ;;  %v3113_v13 = vpop.f32.mrb[9].mxu1  ;;  %v993_v15 = vmul.f32 %v3080_v38, %v3080_v38  ;;  %v991_v17 = vmul.f32 %v807_v44, %v807_v44 }
 0x138   : > { %v3115_v14 = vpop.f32.mrb[10].mxu0  ;;  %1224 = vst.msk [vmem:[%s3049_s6 + $0x1c] sm:$0xf] %vm1216_vm3, %v2462_v6  ;;  %v926_v16 = vadd.f32 %v925_v12, %v924_v54  ;;  %v2460_v18 = vpack.c.bf16 %v807_v44, %v807_v44  ;;  %v3121_v19 = vpop.f32.mrb[10].mxu1  ;;  %v1798_v21 = vmul.f32 %v3084_v43, %v3084_v43  ;;  %2427 = vst.msk [vmem:[%s3049_s6 + $0x9c] sm:$0xf] %vm1216_vm3, %v2494_v11 }
 0x139   : > { %v3123_v20 = vpop.f32.mrb[11].mxu0  ;;  %v1730_v22 = vsel %vm915_vm2, %v1613_v49, 0.0  ;;  %v1796_v23 = vmul.f32 %v1613_v49, %v1613_v49  ;;  %v2492_v24 = vpack.c.bf16 %v1613_v49, %v1613_v49  ;;  %v3130_v25 = vpop.f32.mrb[11].mxu1  ;;  %v1834_v26 = vsel %vm915_vm2, %v1797_v4, 0.0 }
 0x13a   : > { %v928_v27 = vadd.f32 %v927_v62, %v926_v16  ;;  %v1027_v28 = vsel %vm915_vm2, %v991_v17, 0.0  ;;  %1222 = vst.msk [vmem:[%s3049_s6 + $0x14] sm:$0xf] %vm1216_vm3, %v2460_v18  ;;  %v1731_v29 = vadd.f32 %v1730_v22, %v1729_v0  ;;  %v929_v30 = vsel %vm915_vm2, %v3080_v38, 0.0 }
 0x13b   : > { %v1028_v31 = vadd.f32 %v1027_v28, %v1026_v63  ;;  %v1832_v32 = vsel %vm915_vm2, %v1796_v23, 0.0  ;;  %2425 = vst.msk [vmem:[%s3049_s6 + $0x94] sm:$0xf] %vm1216_vm3, %v2492_v24  ;;  %v2465_v33 = vpack.c.bf16 %v3097_v2, %v3097_v2  ;;  %v1031_v34 = vsel %vm915_vm2, %v993_v15, 0.0 }
 0x13c   : > { %v1734_v35 = vsel %vm915_vm2, %v3084_v43, 0.0  ;;  %v1733_v36 = vadd.f32 %v1732_v3, %v1731_v29  ;;  %v1833_v37 = vadd.f32 %v1832_v32, %v1831_v10  ;;  %v1836_v39 = vsel %vm915_vm2, %v1798_v21, 0.0 }
 0x13d   : > { %v1030_v40 = vadd.f32 %v1029_v9, %v1028_v31  ;;  %1227 = vst.msk [vmem:[%s3049_s6 + $0x28] sm:$0xf] %vm1216_vm3, %v2465_v33  ;;  %v2497_v38 = vpack.c.bf16 %v3103_v7, %v3103_v7  ;;  %v930_v41 = vadd.f32 %v929_v30, %v928_v27  ;;  %v996_v45 = vmul.f32 %v3097_v2, %v3097_v2 }
 0x13e   : > { %v3151_v42 = vpop.f32.mrb[12].mxu0  ;;  %v1835_v44 = vadd.f32 %v1834_v26, %v1833_v37  ;;  %v931_v43 = vsel %vm915_vm2, %v3105_v8, 0.0  ;;  %v994_v46 = vmul.f32 %v3105_v8, %v3105_v8  ;;  %v3159_v47 = vpop.f32.mrb[12].mxu1  ;;  %v2463_v51 = vpack.c.bf16 %v3105_v8, %v3105_v8 }
 0x13f   : > { %v3161_v48 = vpop.f32.mrb[13].mxu0  ;;  %2430 = vst.msk [vmem:[%s3049_s6 + $0xa8] sm:$0xf] %vm1216_vm3, %v2497_v38  ;;  %v932_v49 = vadd.f32 %v931_v43, %v930_v41  ;;  %v1032_v50 = vadd.f32 %v1031_v34, %v1030_v40  ;;  %v1735_v52 = vadd.f32 %v1734_v35, %v1733_v36  ;;  %v3167_v53 = vpop.f32.mrb[13].mxu1  ;;  %v1736_v56 = vsel %vm915_vm2, %v3113_v13, 0.0 }
 0x140   : > { %v3169_v54 = vpop.f32.mrb[14].mxu0  ;;  %v1033_v55 = vsel %vm915_vm2, %v994_v46, 0.0  ;;  %v1799_v57 = vmul.f32 %v3113_v13, %v3113_v13  ;;  %v1837_v58 = vadd.f32 %v1836_v39, %v1835_v44  ;;  %v3176_v59 = vpop.f32.mrb[14].mxu1  ;;  %v935_v61 = vsel %vm915_vm2, %v3097_v2, 0.0  ;;  %1225 = vst.msk [vmem:[%s3049_s6 + $0x20] sm:$0xf] %vm1216_vm3, %v2463_v51 }
 0x141   : > { %v3178_v60 = vpop.f32.mrb[15].mxu0  ;;  %v1034_v62 = vadd.f32 %v1033_v55, %v1032_v50  ;;  %v1737_v63 = vadd.f32 %v1736_v56, %v1735_v52  ;;  %v2495_v0 = vpack.c.bf16 %v3113_v13, %v3113_v13  ;;  %v3186_v1 = vpop.f32.mrb[15].mxu1  ;;  %v1740_v3 = vsel %vm915_vm2, %v3103_v7, 0.0 }
 0x142   : > { %v1801_v4 = vmul.f32 %v3103_v7, %v3103_v7  ;;  %v1838_v5 = vsel %vm915_vm2, %v1799_v57, 0.0  ;;  %v2466_v2 = vpack.c.bf16 %v3115_v14, %v3115_v14  ;;  %v1037_v6 = vsel %vm915_vm2, %v996_v45, 0.0 }
 0x143   : > { %v1839_v8 = vadd.f32 %v1838_v5, %v1837_v58  ;;  %2428 = vst.msk [vmem:[%s3049_s6 + $0xa0] sm:$0xf] %vm1216_vm3, %v2495_v0  ;;  %v2498_v9 = vpack.c.bf16 %v3121_v19, %v3121_v19  ;;  %v933_v10 = vsel %vm915_vm2, %v3123_v20, 0.0  ;;  %v997_v7 = vmul.f32 %v3115_v14, %v3115_v14 }
 0x144   : > { %1228 = vst.msk [vmem:[%s3049_s6 + $0x2c] sm:$0xf] %vm1216_vm3, %v2466_v2  ;;  %v934_v11 = vadd.f32 %v933_v10, %v932_v49  ;;  %v995_v12 = vmul.f32 %v3123_v20, %v3123_v20  ;;  %v2464_v13 = vpack.c.bf16 %v3123_v20, %v3123_v20  ;;  %v1802_v15 = vmul.f32 %v3121_v19, %v3121_v19 }
 0x145   : > { %2431 = vst.msk [vmem:[%s3049_s6 + $0xac] sm:$0xf] %vm1216_vm3, %v2498_v9  ;;  %v1738_v16 = vsel %vm915_vm2, %v3130_v25, 0.0  ;;  %v1800_v17 = vmul.f32 %v3130_v25, %v3130_v25  ;;  %v2496_v18 = vpack.c.bf16 %v3130_v25, %v3130_v25  ;;  %v1842_v22 = vsel %vm915_vm2, %v1801_v4, 0.0 }
 0x146   : > { %v3220_v21 = vpop.f32.mrb[16].mxu0  ;;  %v936_v20 = vadd.f32 %v935_v61, %v934_v11  ;;  %v1035_v23 = vsel %vm915_vm2, %v995_v12, 0.0  ;;  %1226 = vst.msk [vmem:[%s3049_s6 + $0x24] sm:$0xf] %vm1216_vm3, %v2464_v13  ;;  %v1739_v24 = vadd.f32 %v1738_v16, %v1737_v63  ;;  %v3226_v26 = vpop.f32.mrb[16].mxu1  ;;  %v937_v28 = vsel %vm915_vm2, %v3115_v14, 0.0 }
 0x147   : > { %v3228_v27 = vpop.f32.mrb[17].mxu0  ;;  %v1036_v29 = vadd.f32 %v1035_v23, %v1034_v62  ;;  %v1840_v25 = vsel %vm915_vm2, %v1800_v17, 0.0  ;;  %2429 = vst.msk [vmem:[%s3049_s6 + $0xa4] sm:$0xf] %vm1216_vm3, %v2496_v18  ;;  %v2469_v30 = vpack.c.bf16 %v3151_v42, %v3151_v42  ;;  %v3237_v31 = vpop.f32.mrb[17].mxu1  ;;  %v1039_v33 = vsel %vm915_vm2, %v997_v7, 0.0 }
 0x148   : > { %v3239_v32 = vpop.f32.mrb[18].mxu0  ;;  %v1742_v34 = vsel %vm915_vm2, %v3121_v19, 0.0  ;;  %v1741_v35 = vadd.f32 %v1740_v3, %v1739_v24  ;;  %v1841_v14 = vadd.f32 %v1840_v25, %v1839_v8  ;;  %v3244_v36 = vpop.f32.mrb[18].mxu1  ;;  %v1844_v39 = vsel %vm915_vm2, %v1802_v15, 0.0 }
 0x149   : > { %v3246_v37 = vpop.f32.mrb[19].mxu0  ;;  %v1038_v40 = vadd.f32 %v1037_v6, %v1036_v29  ;;  %1231 = vst.msk [vmem:[%s3049_s6 + $0x38] sm:$0xf] %vm1216_vm3, %v2469_v30  ;;  %v2501_v38 = vpack.c.bf16 %v3159_v47, %v3159_v47  ;;  %v938_v41 = vadd.f32 %v937_v28, %v936_v20  ;;  %v3253_v44 = vpop.f32.mrb[19].mxu1  ;;  %v1000_v19 = vmul.f32 %v3151_v42, %v3151_v42 }
 0x14a   : > { %v1843_v45 = vadd.f32 %v1842_v22, %v1841_v14  ;;  %v939_v43 = vsel %vm915_vm2, %v3161_v48, 0.0  ;;  %v998_v46 = vmul.f32 %v3161_v48, %v3161_v48  ;;  %v2467_v51 = vpack.c.bf16 %v3161_v48, %v3161_v48 }
 0x14b   : > { %2434 = vst.msk [vmem:[%s3049_s6 + $0xb8] sm:$0xf] %vm1216_vm3, %v2501_v38  ;;  %v940_v49 = vadd.f32 %v939_v43, %v938_v41  ;;  %v1040_v50 = vadd.f32 %v1039_v33, %v1038_v40  ;;  %v1743_v52 = vadd.f32 %v1742_v34, %v1741_v35  ;;  %v1744_v56 = vsel %vm915_vm2, %v3167_v53, 0.0 }
 0x14c   : > { %v1041_v55 = vsel %vm915_vm2, %v998_v46, 0.0  ;;  %v1803_v57 = vmul.f32 %v3167_v53, %v3167_v53  ;;  %v1845_v58 = vadd.f32 %v1844_v39, %v1843_v45  ;;  %v943_v61 = vsel %vm915_vm2, %v3151_v42, 0.0  ;;  %1229 = vst.msk [vmem:[%s3049_s6 + $0x30] sm:$0xf] %vm1216_vm3, %v2467_v51 }
 0x14d   : > { %v1042_v62 = vadd.f32 %v1041_v55, %v1040_v50  ;;  %v1745_v63 = vadd.f32 %v1744_v56, %v1743_v52  ;;  %v2499_v48 = vpack.c.bf16 %v3167_v53, %v3167_v53  ;;  %v1748_v3 = vsel %vm915_vm2, %v3159_v47, 0.0 }
 0x14e   : > { %v3276_v0 = vpop.f32.mrb[20].mxu0  ;;  %v1805_v4 = vmul.f32 %v3159_v47, %v3159_v47  ;;  %v1846_v5 = vsel %vm915_vm2, %v1803_v57, 0.0  ;;  %v2470_v42 = vpack.c.bf16 %v3169_v54, %v3169_v54  ;;  %v3285_v2 = vpop.f32.mrb[20].mxu1  ;;  %v1045_v53 = vsel %vm915_vm2, %v1000_v19, 0.0 }
 0x14f   : > { %v3287_v6 = vpop.f32.mrb[21].mxu0  ;;  %v1847_v8 = vadd.f32 %v1846_v5, %v1845_v58  ;;  %2432 = vst.msk [vmem:[%s3049_s6 + $0xb0] sm:$0xf] %vm1216_vm3, %v2499_v48  ;;  %v2502_v9 = vpack.c.bf16 %v3176_v59, %v3176_v59  ;;  %v941_v47 = vsel %vm915_vm2, %v3178_v60, 0.0  ;;  %v3296_v10 = vpop.f32.mrb[21].mxu1  ;;  %v1001_v11 = vmul.f32 %v3169_v54, %v3169_v54 }
 0x150   : > { %v3298_v7 = vpop.f32.mrb[22].mxu0  ;;  %1232 = vst.msk [vmem:[%s3049_s6 + $0x3c] sm:$0xf] %vm1216_vm3, %v2470_v42  ;;  %v942_v12 = vadd.f32 %v941_v47, %v940_v49  ;;  %v999_v13 = vmul.f32 %v3178_v60, %v3178_v60  ;;  %v2468_v15 = vpack.c.bf16 %v3178_v60, %v3178_v60  ;;  %v3308_v16 = vpop.f32.mrb[22].mxu1  ;;  %v1806_v18 = vmul.f32 %v3176_v59, %v3176_v59 }
 0x151   : > { %v3310_v17 = vpop.f32.mrb[23].mxu0  ;;  %2435 = vst.msk [vmem:[%s3049_s6 + $0xbc] sm:$0xf] %vm1216_vm3, %v2502_v9  ;;  %v1746_v22 = vsel %vm915_vm2, %v3186_v1, 0.0  ;;  %v1804_v20 = vmul.f32 %v3186_v1, %v3186_v1  ;;  %v2500_v23 = vpack.c.bf16 %v3186_v1, %v3186_v1  ;;  %v3322_v60 = vpop.f32.mrb[23].mxu1  ;;  %v1850_v24 = vsel %vm915_vm2, %v1805_v4, 0.0 }
 0x152   : > { %v944_v28 = vadd.f32 %v943_v61, %v942_v12  ;;  %v1043_v29 = vsel %vm915_vm2, %v999_v13, 0.0  ;;  %1230 = vst.msk [vmem:[%s3049_s6 + $0x34] sm:$0xf] %vm1216_vm3, %v2468_v15  ;;  %v1747_v25 = vadd.f32 %v1746_v22, %v1745_v63  ;;  %v945_v30 = vsel %vm915_vm2, %v3169_v54, 0.0 }
 0x153   : > { %v1044_v33 = vadd.f32 %v1043_v29, %v1042_v62  ;;  %v1848_v34 = vsel %vm915_vm2, %v1804_v20, 0.0  ;;  %2433 = vst.msk [vmem:[%s3049_s6 + $0xb4] sm:$0xf] %vm1216_vm3, %v2500_v23  ;;  %v2473_v1 = vpack.c.bf16 %v3220_v21, %v3220_v21  ;;  %v1047_v35 = vsel %vm915_vm2, %v1001_v11, 0.0 }
 0x154   : > { %v1750_v14 = vsel %vm915_vm2, %v3176_v59, 0.0  ;;  %v1749_v39 = vadd.f32 %v1748_v3, %v1747_v25  ;;  %v1849_v40 = vadd.f32 %v1848_v34, %v1847_v8  ;;  %v1852_v38 = vsel %vm915_vm2, %v1806_v18, 0.0 }
 0x155   : > { %v1046_v41 = vadd.f32 %v1045_v53, %v1044_v33  ;;  %1235 = vst.msk [vmem:[%s3049_s6 + $0x48] sm:$0xf] %vm1216_vm3, %v2473_v1  ;;  %v2505_v54 = vpack.c.bf16 %v3226_v26, %v3226_v26  ;;  %v946_v45 = vadd.f32 %v945_v30, %v944_v28  ;;  %v1004_v46 = vmul.f32 %v3220_v21, %v3220_v21 }
 0x156   : > { %v3343_v19 = vpop.f32.mrb[24].mxu0  ;;  %v1851_v43 = vadd.f32 %v1850_v24, %v1849_v40  ;;  %v947_v59 = vsel %vm915_vm2, %v3228_v27, 0.0  ;;  %v1002_v49 = vmul.f32 %v3228_v27, %v3228_v27  ;;  %v3351_v50 = vpop.f32.mrb[24].mxu1  ;;  %v2471_v56 = vpack.c.bf16 %v3228_v27, %v3228_v27 }
 0x157   : > { %v3353_v51 = vpop.f32.mrb[25].mxu0  ;;  %2438 = vst.msk [vmem:[%s3049_s6 + $0xc8] sm:$0xf] %vm1216_vm3, %v2505_v54  ;;  %v948_v52 = vadd.f32 %v947_v59, %v946_v45  ;;  %v1048_v55 = vadd.f32 %v1047_v35, %v1046_v41  ;;  %v1751_v57 = vadd.f32 %v1750_v14, %v1749_v39  ;;  %v3359_v58 = vpop.f32.mrb[25].mxu1  ;;  %v1752_v63 = vsel %vm915_vm2, %v3237_v31, 0.0 }
 0x158   : > { %v3361_v61 = vpop.f32.mrb[26].mxu0  ;;  %v1049_v62 = vsel %vm915_vm2, %v1002_v49, 0.0  ;;  %v1807_v48 = vmul.f32 %v3237_v31, %v3237_v31  ;;  %v1853_v3 = vadd.f32 %v1852_v38, %v1851_v43  ;;  %v3368_v4 = vpop.f32.mrb[26].mxu1  ;;  %v951_v27 = vsel %vm915_vm2, %v3220_v21, 0.0  ;;  %1233 = vst.msk [vmem:[%s3049_s6 + $0x40] sm:$0xf] %vm1216_vm3, %v2471_v56 }
 0x159   : > { %v3370_v5 = vpop.f32.mrb[27].mxu0  ;;  %v1050_v42 = vadd.f32 %v1049_v62, %v1048_v55  ;;  %v1753_v53 = vadd.f32 %v1752_v63, %v1751_v57  ;;  %v2503_v8 = vpack.c.bf16 %v3237_v31, %v3237_v31  ;;  %v3378_v9 = vpop.f32.mrb[27].mxu1  ;;  %v1756_v47 = vsel %vm915_vm2, %v3226_v26, 0.0 }
 0x15a   : > { %v1809_v11 = vmul.f32 %v3226_v26, %v3226_v26  ;;  %v1854_v12 = vsel %vm915_vm2, %v1807_v48, 0.0  ;;  %v2474_v21 = vpack.c.bf16 %v3239_v32, %v3239_v32  ;;  %v1053_v13 = vsel %vm915_vm2, %v1004_v46, 0.0 }
 0x15b   : > { %v1855_v15 = vadd.f32 %v1854_v12, %v1853_v3  ;;  %2436 = vst.msk [vmem:[%s3049_s6 + $0xc0] sm:$0xf] %vm1216_vm3, %v2503_v8  ;;  %v2506_v31 = vpack.c.bf16 %v3244_v36, %v3244_v36  ;;  %v949_v18 = vsel %vm915_vm2, %v3246_v37, 0.0  ;;  %v1005_v26 = vmul.f32 %v3239_v32, %v3239_v32 }
 0x15c   : > { %1236 = vst.msk [vmem:[%s3049_s6 + $0x4c] sm:$0xf] %vm1216_vm3, %v2474_v21  ;;  %v950_v22 = vadd.f32 %v949_v18, %v948_v52  ;;  %v1003_v20 = vmul.f32 %v3246_v37, %v3246_v37  ;;  %v2472_v23 = vpack.c.bf16 %v3246_v37, %v3246_v37  ;;  %v1810_v24 = vmul.f32 %v3244_v36, %v3244_v36 }
 0x15d   : > { %2439 = vst.msk [vmem:[%s3049_s6 + $0xcc] sm:$0xf] %vm1216_vm3, %v2506_v31  ;;  %v1754_v28 = vsel %vm915_vm2, %v3253_v44, 0.0  ;;  %v1808_v29 = vmul.f32 %v3253_v44, %v3253_v44  ;;  %v2504_v25 = vpack.c.bf16 %v3253_v44, %v3253_v44  ;;  %v1858_v33 = vsel %vm915_vm2, %v1809_v11, 0.0 }
 0x15e   : > { %v3412_v30 = vpop.f32.mrb[28].mxu0  ;;  %v952_v37 = vadd.f32 %v951_v27, %v950_v22  ;;  %v1051_v34 = vsel %vm915_vm2, %v1003_v20, 0.0  ;;  %1234 = vst.msk [vmem:[%s3049_s6 + $0x44] sm:$0xf] %vm1216_vm3, %v2472_v23  ;;  %v1755_v1 = vadd.f32 %v1754_v28, %v1753_v53  ;;  %v3418_v35 = vpop.f32.mrb[28].mxu1  ;;  %v953_v39 = vsel %vm915_vm2, %v3239_v32, 0.0 }
 0x15f   : > { %v3420_v14 = vpop.f32.mrb[29].mxu0  ;;  %v1052_v40 = vadd.f32 %v1051_v34, %v1050_v42  ;;  %v1856_v44 = vsel %vm915_vm2, %v1808_v29, 0.0  ;;  %2437 = vst.msk [vmem:[%s3049_s6 + $0xc4] sm:$0xf] %vm1216_vm3, %v2504_v25  ;;  %v2477_v38 = vpack.c.bf16 %v3276_v0, %v3276_v0  ;;  %v3429_v41 = vpop.f32.mrb[29].mxu1  ;;  %v1055_v45 = vsel %vm915_vm2, %v1005_v26, 0.0 }
 0x160   : > { %v3431_v54 = vpop.f32.mrb[30].mxu0  ;;  %v1758_v43 = vsel %vm915_vm2, %v3244_v36, 0.0  ;;  %v1757_v46 = vadd.f32 %v1756_v47, %v1755_v1  ;;  %v1857_v32 = vadd.f32 %v1856_v44, %v1855_v15  ;;  %v3436_v59 = vpop.f32.mrb[30].mxu1  ;;  %v1860_v52 = vsel %vm915_vm2, %v1810_v24, 0.0 }
 0x161   : > { %v3438_v49 = vpop.f32.mrb[31].mxu0  ;;  %v1054_v55 = vadd.f32 %v1053_v13, %v1052_v40  ;;  %1239 = vst.msk [vmem:[%s3049_s6 + $0x58] sm:$0xf] %vm1216_vm3, %v2477_v38  ;;  %v2509_v56 = vpack.c.bf16 %v3285_v2, %v3285_v2  ;;  %v954_v57 = vadd.f32 %v953_v39, %v952_v37  ;;  %v3445_v62 = vpop.f32.mrb[31].mxu1  ;;  %v1008_v36 = vmul.f32 %v3276_v0, %v3276_v0 }
 0x162   : > { %v1859_v63 = vadd.f32 %v1858_v33, %v1857_v32  ;;  %v955_v48 = vsel %vm915_vm2, %v3287_v6, 0.0  ;;  %v1006_v3 = vmul.f32 %v3287_v6, %v3287_v6  ;;  %v2475_v53 = vpack.c.bf16 %v3287_v6, %v3287_v6 }
 0x163   : > { %2442 = vst.msk [vmem:[%s3049_s6 + $0xd8] sm:$0xf] %vm1216_vm3, %v2509_v56  ;;  %v956_v27 = vadd.f32 %v955_v48, %v954_v57  ;;  %v1056_v42 = vadd.f32 %v1055_v45, %v1054_v55  ;;  %v1759_v8 = vadd.f32 %v1758_v43, %v1757_v46  ;;  %v1760_v11 = vsel %vm915_vm2, %v3296_v10, 0.0 }
 0x164   : > { %v1057_v47 = vsel %vm915_vm2, %v1006_v3, 0.0  ;;  %v1811_v12 = vmul.f32 %v3296_v10, %v3296_v10  ;;  %v1861_v21 = vadd.f32 %v1860_v52, %v1859_v63  ;;  %v959_v13 = vsel %vm915_vm2, %v3276_v0, 0.0  ;;  %1237 = vst.msk [vmem:[%s3049_s6 + $0x50] sm:$0xf] %vm1216_vm3, %v2475_v53 }
 0x165   : > { %v1058_v15 = vadd.f32 %v1057_v47, %v1056_v42  ;;  %v1761_v31 = vadd.f32 %v1760_v11, %v1759_v8  ;;  %v2507_v6 = vpack.c.bf16 %v3296_v10, %v3296_v10  ;;  %v1764_v18 = vsel %vm915_vm2, %v3285_v2, 0.0 }
 0x166   : > { %v1813_v26 = vmul.f32 %v3285_v2, %v3285_v2  ;;  %v1862_v22 = vsel %vm915_vm2, %v1811_v12, 0.0  ;;  %v2478_v20 = vpack.c.bf16 %v3298_v7, %v3298_v7  ;;  %v1061_v0 = vsel %vm915_vm2, %v1008_v36, 0.0 }
 0x167   : > { %v1863_v23 = vadd.f32 %v1862_v22, %v1861_v21  ;;  %2440 = vst.msk [vmem:[%s3049_s6 + $0xd0] sm:$0xf] %vm1216_vm3, %v2507_v6  ;;  %v2510_v10 = vpack.c.bf16 %v3308_v16, %v3308_v16  ;;  %v957_v24 = vsel %vm915_vm2, %v3310_v17, 0.0  ;;  %v1009_v2 = vmul.f32 %v3298_v7, %v3298_v7 }
 0x168   : > { %1240 = vst.msk [vmem:[%s3049_s6 + $0x5c] sm:$0xf] %vm1216_vm3, %v2478_v20  ;;  %v958_v28 = vadd.f32 %v957_v24, %v956_v27  ;;  %v1007_v29 = vmul.f32 %v3310_v17, %v3310_v17  ;;  %v2476_v25 = vpack.c.bf16 %v3310_v17, %v3310_v17  ;;  %v1814_v33 = vmul.f32 %v3308_v16, %v3308_v16 }
 0x169   : > { %2443 = vst.msk [vmem:[%s3049_s6 + $0xdc] sm:$0xf] %vm1216_vm3, %v2510_v10  ;;  %v1762_v37 = vsel %vm915_vm2, %v3322_v60, 0.0  ;;  %v1812_v34 = vmul.f32 %v3322_v60, %v3322_v60  ;;  %v2508_v1 = vpack.c.bf16 %v3322_v60, %v3322_v60  ;;  %v1866_v39 = vsel %vm915_vm2, %v1813_v26, 0.0 }
 0x16a   : > { %v960_v40 = vadd.f32 %v959_v13, %v958_v28  ;;  %v1059_v17 = vsel %vm915_vm2, %v1007_v29, 0.0  ;;  %1238 = vst.msk [vmem:[%s3049_s6 + $0x54] sm:$0xf] %vm1216_vm3, %v2476_v25  ;;  %v1763_v44 = vadd.f32 %v1762_v37, %v1761_v31  ;;  %v961_v38 = vsel %vm915_vm2, %v3298_v7, 0.0 }
 0x16b   : > { %v1060_v45 = vadd.f32 %v1059_v17, %v1058_v15  ;;  %v1864_v43 = vsel %vm915_vm2, %v1812_v34, 0.0  ;;  %2441 = vst.msk [vmem:[%s3049_s6 + $0xd4] sm:$0xf] %vm1216_vm3, %v2508_v1  ;;  %v2481_v60 = vpack.c.bf16 %v3343_v19, %v3343_v19  ;;  %v1063_v46 = vsel %vm915_vm2, %v1009_v2, 0.0 }
 0x16c   : > { %v1766_v32 = vsel %vm915_vm2, %v3308_v16, 0.0  ;;  %v1765_v52 = vadd.f32 %v1764_v18, %v1763_v44  ;;  %v1865_v55 = vadd.f32 %v1864_v43, %v1863_v23  ;;  %v1868_v56 = vsel %vm915_vm2, %v1814_v33, 0.0 }
 0x16d   : > { %v1062_v57 = vadd.f32 %v1061_v0, %v1060_v45  ;;  %1243 = vst.msk [vmem:[%s3049_s6 + $0x68] sm:$0xf] %vm1216_vm3, %v2481_v60  ;;  %v2513_v7 = vpack.c.bf16 %v3351_v50, %v3351_v50  ;;  %v962_v63 = vadd.f32 %v961_v38, %v960_v40  ;;  %v1012_v48 = vmul.f32 %v3343_v19, %v3343_v19 }
 0x16e   : > { %v1867_v36 = vadd.f32 %v1866_v39, %v1865_v55  ;;  %v963_v3 = vsel %vm915_vm2, %v3353_v51, 0.0  ;;  %v1010_v16 = vmul.f32 %v3353_v51, %v3353_v51  ;;  %v2479_v53 = vpack.c.bf16 %v3353_v51, %v3353_v51 }
 0x16f   : > { %2446 = vst.msk [vmem:[%s3049_s6 + $0xe8] sm:$0xf] %vm1216_vm3, %v2513_v7  ;;  %v964_v27 = vadd.f32 %v963_v3, %v962_v63  ;;  %v1064_v42 = vadd.f32 %v1063_v46, %v1062_v57  ;;  %v1767_v8 = vadd.f32 %v1766_v32, %v1765_v52  ;;  %v1768_v11 = vsel %vm915_vm2, %v3359_v58, 0.0 }
 0x170   : > { %v1065_v47 = vsel %vm915_vm2, %v1010_v16, 0.0  ;;  %v1815_v12 = vmul.f32 %v3359_v58, %v3359_v58  ;;  %v1869_v21 = vadd.f32 %v1868_v56, %v1867_v36  ;;  %1241 = vst.msk [vmem:[%s3049_s6 + $0x60] sm:$0xf] %vm1216_vm3, %v2479_v53  ;;  %v2511_v31 = vpack.c.bf16 %v3359_v58, %v3359_v58 }
 0x171   : > { %v1066_v13 = vadd.f32 %v1065_v47, %v1064_v42  ;;  %v1769_v15 = vadd.f32 %v1768_v11, %v1767_v8  ;;  %v967_v51 = vsel %vm915_vm2, %v3343_v19, 0.0  ;;  %v1772_v6 = vsel %vm915_vm2, %v3351_v50, 0.0 }
 0x172   : > { %v1870_v18 = vsel %vm915_vm2, %v1815_v12, 0.0  ;;  %v2482_v26 = vpack.c.bf16 %v3361_v61, %v3361_v61  ;;  %v1817_v22 = vmul.f32 %v3351_v50, %v3351_v50  ;;  %2444 = vst.msk [vmem:[%s3049_s6 + $0xe0] sm:$0xf] %vm1216_vm3, %v2511_v31  ;;  %v2514_v58 = vpack.c.bf16 %v3368_v4, %v3368_v4 }
 0x173   : > { %v1871_v20 = vadd.f32 %v1870_v18, %v1869_v21  ;;  %v965_v19 = vsel %vm915_vm2, %v3370_v5, 0.0  ;;  %v1069_v0 = vsel %vm915_vm2, %v1012_v48, 0.0  ;;  %v1011_v10 = vmul.f32 %v3370_v5, %v3370_v5 }
 0x174   : > { %1244 = vst.msk [vmem:[%s3049_s6 + $0x6c] sm:$0xf] %vm1216_vm3, %v2482_v26  ;;  %v966_v23 = vadd.f32 %v965_v19, %v964_v27  ;;  %v2480_v50 = vpack.c.bf16 %v3370_v5, %v3370_v5  ;;  %v1013_v24 = vmul.f32 %v3361_v61, %v3361_v61  ;;  %2447 = vst.msk [vmem:[%s3049_s6 + $0xec] sm:$0xf] %vm1216_vm3, %v2514_v58  ;;  %v1770_v2 = vsel %vm915_vm2, %v3378_v9, 0.0 }
 0x175   : > { %v1816_v28 = vmul.f32 %v3378_v9, %v3378_v9  ;;  %v2512_v29 = vpack.c.bf16 %v3378_v9, %v3378_v9  ;;  %v1818_v25 = vmul.f32 %v3368_v4, %v3368_v4  ;;  %v1067_v5 = vsel %vm915_vm2, %v1011_v10, 0.0 }
 0x176   : > { %v968_v33 = vadd.f32 %v967_v51, %v966_v23  ;;  %1242 = vst.msk [vmem:[%s3049_s6 + $0x64] sm:$0xf] %vm1216_vm3, %v2480_v50  ;;  %v1771_v37 = vadd.f32 %v1770_v2, %v1769_v15  ;;  %v1874_v34 = vsel %vm915_vm2, %v1817_v22, 0.0  ;;  %v1068_v1 = vadd.f32 %v1067_v5, %v1066_v13 }
 0x177   : > { %v1872_v39 = vsel %vm915_vm2, %v1816_v28, 0.0  ;;  %2445 = vst.msk [vmem:[%s3049_s6 + $0xe4] sm:$0xf] %vm1216_vm3, %v2512_v29  ;;  %v2485_v9 = vpack.c.bf16 %v3412_v30, %v3412_v30  ;;  %v969_v40 = vsel %vm915_vm2, %v3361_v61, 0.0  ;;  %v1774_v17 = vsel %vm915_vm2, %v3368_v4, 0.0 }
 0x178   : > { %v1773_v44 = vadd.f32 %v1772_v6, %v1771_v37  ;;  %v1873_v38 = vadd.f32 %v1872_v39, %v1871_v20  ;;  %v1071_v45 = vsel %vm915_vm2, %v1013_v24, 0.0  ;;  %v1070_v43 = vadd.f32 %v1069_v0, %v1068_v1 }
 0x179   : > { %1247 = vst.msk [vmem:[%s3049_s6 + $0x78] sm:$0xf] %vm1216_vm3, %v2485_v9  ;;  %v2517_v60 = vpack.c.bf16 %v3418_v35, %v3418_v35  ;;  %v970_v46 = vadd.f32 %v969_v40, %v968_v33  ;;  %v1876_v32 = vsel %vm915_vm2, %v1818_v25, 0.0  ;;  %v971_v61 = vsel %vm915_vm2, %v3420_v14, 0.0 }
 0x17a   : > { %v1875_v52 = vadd.f32 %v1874_v34, %v1873_v38  ;;  %v1014_v4 = vmul.f32 %v3420_v14, %v3420_v14  ;;  %v1072_v56 = vadd.f32 %v1071_v45, %v1070_v43  ;;  %v2483_v57 = vpack.c.bf16 %v3420_v14, %v3420_v14 }
 0x17b   : > { %2450 = vst.msk [vmem:[%s3049_s6 + $0xf8] sm:$0xf] %vm1216_vm3, %v2517_v60  ;;  %v972_v55 = vadd.f32 %v971_v61, %v970_v46  ;;  %v1775_v7 = vadd.f32 %v1774_v17, %v1773_v44  ;;  %v1776_v36 = vsel %vm915_vm2, %v3429_v41, 0.0  ;;  %v1819_v48 = vmul.f32 %v3429_v41, %v3429_v41 }
 0x17c   : > { %v1073_v63 = vsel %vm915_vm2, %v1014_v4, 0.0  ;;  %v1877_v3 = vadd.f32 %v1876_v32, %v1875_v52  ;;  %1245 = vst.msk [vmem:[%s3049_s6 + $0x70] sm:$0xf] %vm1216_vm3, %v2483_v57  ;;  %v2515_v42 = vpack.c.bf16 %v3429_v41, %v3429_v41  ;;  %v975_v14 = vsel %vm915_vm2, %v3412_v30, 0.0 }
 0x17d   : > { %v1074_v16 = vadd.f32 %v1073_v63, %v1072_v56  ;;  %v1777_v27 = vadd.f32 %v1776_v36, %v1775_v7  ;;  %v1878_v53 = vsel %vm915_vm2, %v1819_v48, 0.0  ;;  %v2486_v8 = vpack.c.bf16 %v3431_v54, %v3431_v54 }
 0x17e   : > { %v1016_v47 = vmul.f32 %v3412_v30, %v3412_v30  ;;  %v1879_v11 = vadd.f32 %v1878_v53, %v1877_v3  ;;  %2448 = vst.msk [vmem:[%s3049_s6 + $0xf0] sm:$0xf] %vm1216_vm3, %v2515_v42  ;;  %v2518_v12 = vpack.c.bf16 %v3436_v59, %v3436_v59  ;;  %v973_v41 = vsel %vm915_vm2, %v3438_v49, 0.0 }
 0x17f   : > { %v1780_v21 = vsel %vm915_vm2, %v3418_v35, 0.0  ;;  %1248 = vst.msk [vmem:[%s3049_s6 + $0x7c] sm:$0xf] %vm1216_vm3, %v2486_v8  ;;  %v974_v13 = vadd.f32 %v973_v41, %v972_v55  ;;  %v1015_v15 = vmul.f32 %v3438_v49, %v3438_v49  ;;  %v2484_v30 = vpack.c.bf16 %v3438_v49, %v3438_v49 }
 0x180   : > { %v1821_v31 = vmul.f32 %v3418_v35, %v3418_v35  ;;  %2451 = vst.msk [vmem:[%s3049_s6 + $0xfc] sm:$0xf] %vm1216_vm3, %v2518_v12  ;;  %v1778_v51 = vsel %vm915_vm2, %v3445_v62, 0.0  ;;  %v1820_v6 = vmul.f32 %v3445_v62, %v3445_v62  ;;  %v2516_v18 = vpack.c.bf16 %v3445_v62, %v3445_v62 }
 0x181   : > { %v1017_v26 = vmul.f32 %v3431_v54, %v3431_v54  ;;  %v976_v22 = vadd.f32 %v975_v14, %v974_v13  ;;  %v1075_v49 = vsel %vm915_vm2, %v1015_v15, 0.0  ;;  %1246 = vst.msk [vmem:[%s3049_s6 + $0x74] sm:$0xf] %vm1216_vm3, %v2484_v30  ;;  %v1779_v35 = vadd.f32 %v1778_v51, %v1777_v27 }
 0x182   : > { %v977_v20 = vsel %vm915_vm2, %v3431_v54, 0.0  ;;  %v1822_v58 = vmul.f32 %v3436_v59, %v3436_v59  ;;  %v1076_v19 = vadd.f32 %v1075_v49, %v1074_v16  ;;  %v1880_v0 = vsel %vm915_vm2, %v1820_v6, 0.0  ;;  %2449 = vst.msk [vmem:[%s3049_s6 + $0xf4] sm:$0xf] %vm1216_vm3, %v2516_v18 }
 0x183   : > { %v1077_v62 = vsel %vm915_vm2, %v1016_v47, 0.0  ;;  %v978_v23 = vadd.f32 %v977_v20, %v976_v22  ;;  %v1781_v10 = vadd.f32 %v1780_v21, %v1779_v35  ;;  %v1881_v50 = vadd.f32 %v1880_v0, %v1879_v11 }
 0x184   : > { %v1882_v24 = vsel %vm915_vm2, %v1821_v31, 0.0  ;;  %v1782_v2 = vsel %vm915_vm2, %v3436_v59, 0.0  ;;  %v1078_v28 = vadd.f32 %v1077_v62, %v1076_v19  ;;  %v1079_v54 = vsel %vm915_vm2, %v1017_v26, 0.0 }
 0x185   : > { %v979_v29 = vrot.slane %v978_v23, 4  ;;  %v1783_v25 = vadd.f32 %v1782_v2, %v1781_v10  ;;  %v1883_v33 = vadd.f32 %v1882_v24, %v1881_v50  ;;  %v1884_v5 = vsel %vm915_vm2, %v1822_v58, 0.0 }
 0x186   : > { %v1080_v37 = vadd.f32 %v1079_v54, %v1078_v28 }
 0x187   : > { %v980_v34 = vadd.f32 %v979_v29, %v978_v23  ;;  %v1784_v1 = vrot.slane %v1783_v25, 4  ;;  %v1885_v39 = vadd.f32 %v1884_v5, %v1883_v33 }
 0x188   : > { %v1081_v9 = vrot.slane %v1080_v37, 4 }
 0x189   : > { %v981_v40 = vrot.slane %v980_v34, 2  ;;  %v1785_v17 = vadd.f32 %v1784_v1, %v1783_v25  ;;  %v1886_v44 = vrot.slane %v1885_v39, 4 }
 0x18a   : > { %v1082_v38 = vadd.f32 %v1081_v9, %v1080_v37 }
 0x18b   : > { %v982_v45 = vadd.f32 %v981_v40, %v980_v34  ;;  %v1786_v59 = vrot.slane %v1785_v17, 2  ;;  %v1887_v43 = vadd.f32 %v1886_v44, %v1885_v39 }
 0x18c   : > { %v1083_v60 = vrot.slane %v1082_v38, 2 }
 0x18d   : > { %v983_v46 = vrot.slane %v982_v45, 1  ;;  %v1787_v32 = vadd.f32 %v1786_v59, %v1785_v17  ;;  %v1888_v52 = vrot.slane %v1887_v43, 2 }
 0x18e   : > { %v1084_v61 = vadd.f32 %v1083_v60, %v1082_v38 }
 0x18f   : > { %v984_v4 = vadd.f32 %v983_v46, %v982_v45  ;;  %v1788_v55 = vrot.slane %v1787_v32, 1  ;;  %v1889_v56 = vadd.f32 %v1888_v52, %v1887_v43 }
 0x190   : > { %v1085_v57 = vrot.slane %v1084_v61, 1 }
 0x191   : > { %v1789_v7 = vadd.f32 %v1788_v55, %v1787_v32  ;;  %v1890_v63 = vrot.slane %v1889_v56, 1 }
 0x192   : > { %v1086_v36 = vadd.f32 %v1085_v57, %v1084_v61 }
 0x193   : > { %v1790_v48 = vadd.f32 %v1789_v7, %v984_v4  ;;  %v1891_v3 = vadd.f32 %v1890_v63, %v1889_v56 }
 0x195   : > { %v1892_v16 = vadd.f32 %v1891_v3, %v1086_v36  ;;  %2055 = vst.msk [vmem:[%s211_s9] sm:$0x1] %vm2054_vm4, %v1790_v48 }
 0x197   : > { %2056 = vst.msk [vmem:[%s214_s12] sm:$0x1] %vm2054_vm4, %v1892_v16 }
 0x198 PF: > { %s15_s15 = sadd.s32 1, %s2858_s15  }
 0x199   : > { %p12_p4 = scmp.ge.s32.totalorder %s15_s15, 4  }
 0x19b   :  { %14 = sbr.rel (!%p12_p4) target bundleno = 1 (0x1), region = 88 }

</bundles_post_ra>
